<compile_context>
chip_gen: v6e
topology: v6e:2x2x1
jax: 0.10.0
libtpu: 0.0.40
codegen_flags: <defaults>
</compile_context>

<pallas_src>
import math
import numpy as np
import jax
import jax.numpy as jnp
from jax.experimental import pallas as pl
from jax.experimental.pallas import tpu as pltpu


# --------------------------------------------------------------------------
# Fused Pallas kernel: separable ROIAlign (all levels) + spatial attention conv
# --------------------------------------------------------------------------

def _make_fused_roi_kernel(L, out_size, C):
    P = out_size * out_size

    def kernel(bidx_ref, *refs):
        # bidx_ref (SMEM, scalar-prefetched) is only consumed by the index_maps.
        del bidx_ref
        feat_refs = refs[0:L]                      # each (1, C, H_l, W_l)
        rw_refs = refs[L:2 * L]                    # each (1, out, H_l)
        cw_refs = refs[2 * L:3 * L]                # each (1, out, W_l)
        w1_ref, b1_ref, w2_ref, b2_ref, mask_ref = refs[3 * L:3 * L + 5]
        out_ref = refs[3 * L + 5]                  # (1, P, C)

        # ---- separable ROIAlign per level (all resident in VMEM) ----------
        pooled = []
        for l in range(L):
            feat = feat_refs[l][0]                 # (C, H, W) channel-major
            rw = rw_refs[l][0]                     # (out, H) row weights
            cw = cw_refs[l][0]                     # (out, W) col weights
            H = feat.shape[1]
            # contract H, batched over channels: (C,out,H) x (C,H,W) -> (C,out,W)
            rw_b = jnp.broadcast_to(rw[None, :, :], (C, out_size, H))
            tmp = jax.lax.dot_general(
                rw_b, feat,
                dimension_numbers=(((2,), (1,)), ((0,), (0,))),
                preferred_element_type=jnp.float32)
            # contract W row-by-row: (out,W) . (C,W)^T -> (out,C); stack -> (P,C)
            rows = []
            for p in range(out_size):
                tp = tmp[:, p, :]                  # (C, W)
                rows.append(jax.lax.dot_general(
                    cw, tp,
                    dimension_numbers=(((1,), (1,)), ((), ())),
                    preferred_element_type=jnp.float32))
            pooled.append(jnp.concatenate(rows, axis=0))       # (P, C)

        # ---- spatial_attention_conv stage 1: 1x1 conv + ReLU --------------
        y = b1_ref[...]                                        # (1, C) broadcasts
        for l in range(L):
            y = y + jnp.dot(pooled[l], w1_ref[l],
                            preferred_element_type=jnp.float32)
        y = jnp.maximum(y, 0.0)                                # (P, C)

        # ---- stage 2: 3x3 conv (padding=1) via in-VMEM row-shifted taps ---
        zpad = jnp.zeros((out_size + 1, C), jnp.float32)
        ybig = jnp.concatenate([zpad, y, zpad], axis=0)        # (P + 2*out + 2, C)
        att = b2_ref[...]                                      # (1, L) broadcasts
        for kh in range(3):
            for kw in range(3):
                off = (out_size + 1) + (kh - 1) * out_size + (kw - 1)
                tap = ybig[off:off + P, :]                     # (P, C)
                if kw == 0:        # left neighbour invalid when q == 0
                    tap = tap * mask_ref[:, 0:1]
                elif kw == 2:      # right neighbour invalid when q == out-1
                    tap = tap * mask_ref[:, 1:2]
                att = att + jnp.dot(tap, w2_ref[kh * 3 + kw],
                                    preferred_element_type=jnp.float32)
        sig = 1.0 / (1.0 + jnp.exp(-att))                      # (P, L)

        # ---- attention-weighted fusion of the per-level pooled features ---
        acc = sig[:, 0:1] * pooled[0]
        for l in range(1, L):
            acc = acc + sig[:, l:l + 1] * pooled[l]
        out_ref[0] = acc.astype(out_ref.dtype)

    return kernel


def fused_roi_pool(batch_idx, feats, rws, cws, w1r, b1, w2r, b2, col_masks,
                   out_size, C):
    """batch_idx (M,) int32; feats: list of (N,C,H,W); rws/cws: per-level (M,out,H/W)."""
    L = len(feats)
    M = int(rws[0].shape[0])
    P = out_size * out_size

    in_specs = []
    for f in feats:
        in_specs.append(pl.BlockSpec((1,) + tuple(f.shape[1:]),
                                     lambda m, bidx: (bidx[m], 0, 0, 0)))
    for r in rws:
        in_specs.append(pl.BlockSpec((1,) + tuple(r.shape[1:]),
                                     lambda m, bidx: (m, 0, 0)))
    for c in cws:
        in_specs.append(pl.BlockSpec((1,) + tuple(c.shape[1:]),
                                     lambda m, bidx: (m, 0, 0)))
    in_specs += [
        pl.BlockSpec(tuple(w1r.shape), lambda m, bidx: (0, 0, 0)),
        pl.BlockSpec(tuple(b1.shape), lambda m, bidx: (0, 0)),
        pl.BlockSpec(tuple(w2r.shape), lambda m, bidx: (0, 0, 0)),
        pl.BlockSpec(tuple(b2.shape), lambda m, bidx: (0, 0)),
        pl.BlockSpec(tuple(col_masks.shape), lambda m, bidx: (0, 0)),
    ]

    kernel = _make_fused_roi_kernel(L, out_size, C)
    return pl.pallas_call(
        kernel,
        out_shape=jax.ShapeDtypeStruct((M, P, C), jnp.float32),
        grid_spec=pltpu.PrefetchScalarGridSpec(
            num_scalar_prefetch=1,
            grid=(M,),
            in_specs=in_specs,
            out_specs=pl.BlockSpec((1, P, C), lambda m, bidx: (m, 0, 0)),
        ),
        compiler_params=pltpu.CompilerParams(
            dimension_semantics=("parallel",)),
    )(batch_idx, *feats, *rws, *cws, w1r, b1, w2r, b2, col_masks)


# --------------------------------------------------------------------------
# JAX glue: box formatting and separable ROIAlign bilinear weights (index math)
# --------------------------------------------------------------------------

def convert_boxes_to_pooler_format(box_lists):
    parts = []
    for i, b in enumerate(box_lists):
        idx = jnp.full((b.shape[0], 1), float(i), dtype=b.dtype)
        parts.append(jnp.concatenate([idx, b], axis=1))
    return jnp.concatenate(parts, axis=0)          # (M, 5)


def _axis_sample_weights(start, bin_sz, out_size, g, size):
    """Separable bilinear weights along one axis, summed over the g samples/bin.

    start, bin_sz: (M,)  ->  (M, out_size, size)
    Matches detectron2 ROIAlign bilinear_interpolate clamping semantics.
    """
    p = jnp.arange(out_size, dtype=jnp.float32)
    s = jnp.arange(g, dtype=jnp.float32)
    coord = (start[:, None, None]
             + p[None, :, None] * bin_sz[:, None, None]
             + (s[None, None, :] + 0.5) * bin_sz[:, None, None] / g)   # (M, out, g)
    valid = ((coord >= -1.0) & (coord <= size)).astype(jnp.float32)
    c = jnp.maximum(coord, 0.0)
    low_raw = jnp.floor(c).astype(jnp.int32)
    at_edge = low_raw >= size - 1
    low = jnp.where(at_edge, size - 1, low_raw)
    high = jnp.where(at_edge, size - 1, low_raw + 1)
    c = jnp.where(at_edge, float(size - 1), c)
    l = c - low.astype(jnp.float32)
    h = 1.0 - l
    oh_low = jax.nn.one_hot(low, size, dtype=jnp.float32)    # (M, out, g, size)
    oh_high = jax.nn.one_hot(high, size, dtype=jnp.float32)
    w = (h[..., None] * oh_low + l[..., None] * oh_high) * valid[..., None]
    return w.sum(axis=2)                                      # (M, out, size)


def separable_roi_align_weights(boxes, spatial_scale, H, W, out_size,
                                sampling_ratio, aligned=True):
    """Separable bilinear sampling weights: Rw (M,out,H), Cw (M,out,W)."""
    offset = 0.5 if aligned else 0.0
    x0 = boxes[:, 0] * spatial_scale - offset
    y0 = boxes[:, 1] * spatial_scale - offset
    x1 = boxes[:, 2] * spatial_scale - offset
    y1 = boxes[:, 3] * spatial_scale - offset
    roi_w = x1 - x0
    roi_h = y1 - y0
    if not aligned:
        roi_w = jnp.maximum(roi_w, 1.0)
        roi_h = jnp.maximum(roi_h, 1.0)
    bin_h = roi_h / out_size
    bin_w = roi_w / out_size
    g = sampling_ratio
    rw = _axis_sample_weights(y0, bin_h, out_size, g, H) / g   # (M, out, H)
    cw = _axis_sample_weights(x0, bin_w, out_size, g, W) / g   # (M, out, W)
    return rw, cw


# --------------------------------------------------------------------------
# ROIPooler (Pallas-backed)
# --------------------------------------------------------------------------

class ROIPoolerPallas:
    """AugFPN ROIPooler with pooler_type='ROIAlignV2' (aligned=True)."""

    def __init__(self, output_size, scales, sampling_ratio,
                 canonical_box_size=224, canonical_level=4, out_channels=4,
                 key=jax.random.PRNGKey(0)):
        if isinstance(output_size, int):
            output_size = (output_size, output_size)
        assert len(output_size) == 2
        self.output_size = output_size[0]
        self.scales = list(scales)
        self.sampling_ratio = sampling_ratio
        min_level = -math.log2(scales[0])
        max_level = -math.log2(scales[-1])
        assert math.isclose(min_level, int(min_level))
        assert math.isclose(max_level, int(max_level))
        assert len(scales) == int(max_level) - int(min_level) + 1
        self.canonical_level = canonical_level
        self.canonical_box_size = canonical_box_size
        self.out_channels = out_channels
        # spatial_attention_conv parameters (deterministic init)
        C, L = out_channels, canonical_level
        k1, k2, k3, k4 = jax.random.split(key, 4)
        self.w1 = 0.1 * jax.random.normal(k1, (C, C * L), jnp.float32)   # 1x1 conv (C_out, C_in)
        self.b1 = 0.1 * jax.random.normal(k2, (C,), jnp.float32)
        self.w2 = 0.1 * jax.random.normal(k3, (L, C, 3, 3), jnp.float32)  # 3x3 conv
        self.b2 = 0.1 * jax.random.normal(k4, (L,), jnp.float32)

    # ---- shared glue -----------------------------------------------------
    def _prep(self, x_list, box_lists):
        pooler_fmt = convert_boxes_to_pooler_format(box_lists)   # (M, 5)
        batch_idx = pooler_fmt[:, 0].astype(jnp.int32)
        boxes = pooler_fmt[:, 1:5]
        out = self.output_size
        rws, cws = [], []
        for feat, scale in zip(x_list, self.scales):
            _, _, H, W = feat.shape
            rw, cw = separable_roi_align_weights(boxes, scale, H, W, out,
                                                 self.sampling_ratio, aligned=True)
            rws.append(rw)
            cws.append(cw)
        return batch_idx, rws, cws

    def _attention_params(self):
        C, L = self.out_channels, self.canonical_level
        # 1x1 conv weights per level, transposed for right-hand matmul: (L, C_in, C_out)
        w1r = jnp.transpose(self.w1.reshape(C, L, C), (1, 2, 0))
        b1 = self.b1[None, :]                                           # (1, C)
        # 3x3 conv weights per tap, transposed: (9, C_in, L)
        w2r = jnp.transpose(self.w2, (2, 3, 1, 0)).reshape(9, C, L)
        b2 = self.b2[None, :]                                           # (1, L)
        return w1r, b1, w2r, b2

    # ---- Pallas forward --------------------------------------------------
    def forward(self, x_list, box_lists):
        assert len(x_list) == len(self.scales)
        assert len(box_lists) == x_list[0].shape[0]
        out = self.output_size
        C = self.out_channels
        P = out * out
        batch_idx, rws, cws = self._prep(x_list, box_lists)
        w1r, b1, w2r, b2 = self._attention_params()
        # per-output-position column validity masks for the 3x3 conv taps
        q = jnp.arange(P, dtype=jnp.int32) % out
        col_masks = jnp.stack([(q != 0), (q != out - 1)],
                              axis=1).astype(jnp.float32)               # (P, 2)

        fused = fused_roi_pool(batch_idx, list(x_list), rws, cws,
                               w1r, b1, w2r, b2, col_masks, out, C)     # (M, P, C)
        M = fused.shape[0]
        # back to PyTorch layout (M, C, out, out)
        return jnp.transpose(fused.reshape(M, out, out, C), (0, 3, 1, 2))

    # ---- pure-JAX reference (same math, no Pallas) -----------------------
    def reference_forward(self, x_list, box_lists):
        out = self.output_size
        C = self.out_channels
        L = len(self.scales)
        P = out * out
        batch_idx, rws, cws = self._prep(x_list, box_lists)
        pooled = []
        for feat, rw, cw in zip(x_list, rws, cws):
            froi = feat[batch_idx]                                      # (M, C, H, W)
            p4 = jnp.einsum('mph,mchw,mqw->mpqc', rw, froi, cw,
                            precision='highest')
            pooled.append(p4.reshape(-1, P, C))
        M = pooled[0].shape[0]
        x_cat = jnp.concatenate(pooled, axis=-1)                        # (M, P, L*C)
        y = jax.nn.relu(jnp.einsum('mpk,kc->mpc', x_cat, jnp.transpose(self.w1),
                                   precision='highest') + self.b1)
        y_img = y.reshape(M, out, out, C)
        y_pad = jnp.pad(y_img, ((0, 0), (1, 1), (1, 1), (0, 0)))
        patches = jnp.concatenate(
            [y_pad[:, kh:kh + out, kw:kw + out, :]
             for kh in range(3) for kw in range(3)],
            axis=-1).reshape(M, P, 9 * C)
        w2_flat = jnp.transpose(self.w2, (2, 3, 1, 0)).reshape(9 * C, L)
        att = jnp.einsum('mpk,kl->mpl', patches, w2_flat,
                         precision='highest') + self.b2
        sig = jax.nn.sigmoid(att)
        fused = sum(sig[:, :, l:l + 1] * pooled[l] for l in range(L))
        return jnp.transpose(fused.reshape(M, out, out, C), (0, 3, 1, 2))


# --------------------------------------------------------------------------
# main
# --------------------------------------------------------------------------

if __name__ == "__main__":
    key = jax.random.PRNGKey(0)
    keys = jax.random.split(key, 8)

    N = 2                # batch images
    C = 4                # out_channels (= feature channels)
    L = 4                # canonical_level = number of FPN levels used
    out_size = 4         # pooled output size
    sampling_ratio = 2
    scales = [1.0 / 4, 1.0 / 8, 1.0 / 16, 1.0 / 32]
    img_size = 64

    # FPN feature maps (NCHW): (2,4,16,16), (2,4,8,8), (2,4,4,4), (2,4,2,2)
    x_list = []
    for l, s in enumerate(scales):
        H = int(round(img_size * s))
        x_list.append(jax.random.normal(keys[l], (N, C, H, H), jnp.float32))

    # 4 boxes per image, (x0, y0, x1, y1) in image coordinates
    box_lists = []
    for n in range(N):
        k = keys[4 + n]
        xy0 = jax.random.uniform(k, (4, 2), minval=0.0, maxval=40.0)
        wh = jax.random.uniform(jax.random.fold_in(k, 1), (4, 2),
                                minval=4.0, maxval=24.0)
        box_lists.append(jnp.concatenate([xy0, xy0 + wh], axis=1).astype(jnp.float32))

    pooler = ROIPoolerPallas(out_size, scales, sampling_ratio,
                             canonical_level=L, out_channels=C, key=keys[7])

    result = jax.block_until_ready(pooler.forward(x_list, box_lists))
    assert result.shape == (8, C, out_size, out_size)

    ref = jax.block_until_ready(pooler.reference_forward(x_list, box_lists))
    np.testing.assert_allclose(np.asarray(result), np.asarray(ref),
                               rtol=1e-4, atol=2e-4)
    print("KERNEL_OK")
</pallas_src>

<mosaic_0001>
module attributes {stable_mosaic.version = 11 : i64} {
  func.func @kernel(%arg0: i32, %arg1: memref<8xi32, #tpu.memory_space<smem>>, %arg2: memref<1x4x16x16xf32, #tpu.memory_space<vmem>>, %arg3: memref<1x4x8x8xf32, #tpu.memory_space<vmem>>, %arg4: memref<1x4x4x4xf32, #tpu.memory_space<vmem>>, %arg5: memref<1x4x2x2xf32, #tpu.memory_space<vmem>>, %arg6: memref<1x4x16xf32, #tpu.memory_space<vmem>>, %arg7: memref<1x4x8xf32, #tpu.memory_space<vmem>>, %arg8: memref<1x4x4xf32, #tpu.memory_space<vmem>>, %arg9: memref<1x4x2xf32, #tpu.memory_space<vmem>>, %arg10: memref<1x4x16xf32, #tpu.memory_space<vmem>>, %arg11: memref<1x4x8xf32, #tpu.memory_space<vmem>>, %arg12: memref<1x4x4xf32, #tpu.memory_space<vmem>>, %arg13: memref<1x4x2xf32, #tpu.memory_space<vmem>>, %arg14: memref<4x4x4xf32, #tpu.memory_space<vmem>>, %arg15: memref<1x4xf32, #tpu.memory_space<vmem>>, %arg16: memref<9x4x4xf32, #tpu.memory_space<vmem>>, %arg17: memref<1x4xf32, #tpu.memory_space<vmem>>, %arg18: memref<16x2xf32, #tpu.memory_space<vmem>>, %arg19: memref<1x16x4xf32, #tpu.memory_space<vmem>>) attributes {dimension_semantics = [#tpu.dimension_semantics<parallel>], iteration_bounds = array<i64: 8>, scalar_prefetch = 1 : i64, scratch_operands = 0 : i64, tpu.core_type = #tpu.core_type<tc>, window_params = [{transform_indices = @transform_0, window_bounds = array<i64: 1, 4, 16, 16>}, {transform_indices = @transform_1, window_bounds = array<i64: 1, 4, 8, 8>}, {transform_indices = @transform_2, window_bounds = array<i64: 1, 4, 4, 4>}, {transform_indices = @transform_3, window_bounds = array<i64: 1, 4, 2, 2>}, {transform_indices = @transform_4, window_bounds = array<i64: 1, 4, 16>}, {transform_indices = @transform_5, window_bounds = array<i64: 1, 4, 8>}, {transform_indices = @transform_6, window_bounds = array<i64: 1, 4, 4>}, {transform_indices = @transform_7, window_bounds = array<i64: 1, 4, 2>}, {transform_indices = @transform_8, window_bounds = array<i64: 1, 4, 16>}, {transform_indices = @transform_9, window_bounds = array<i64: 1, 4, 8>}, {transform_indices = @transform_10, window_bounds = array<i64: 1, 4, 4>}, {transform_indices = @transform_11, window_bounds = array<i64: 1, 4, 2>}, {pipeline_mode = #tpu.pipeline_mode<synchronous>, transform_indices = @transform_12, window_bounds = array<i64: 4, 4, 4>}, {pipeline_mode = #tpu.pipeline_mode<synchronous>, transform_indices = @transform_13, window_bounds = array<i64: 1, 4>}, {pipeline_mode = #tpu.pipeline_mode<synchronous>, transform_indices = @transform_14, window_bounds = array<i64: 9, 4, 4>}, {pipeline_mode = #tpu.pipeline_mode<synchronous>, transform_indices = @transform_15, window_bounds = array<i64: 1, 4>}, {pipeline_mode = #tpu.pipeline_mode<synchronous>, transform_indices = @transform_16, window_bounds = array<i64: 16, 2>}, {transform_indices = @transform_17, window_bounds = array<i64: 1, 16, 4>}]} {
    %c0 = arith.constant 0 : index
    %c0_0 = arith.constant 0 : index
    %c0_1 = arith.constant 0 : index
    %c0_2 = arith.constant 0 : index
    %0 = vector.load %arg2[%c0, %c0_0, %c0_1, %c0_2] : memref<1x4x16x16xf32, #tpu.memory_space<vmem>>, vector<1x4x16x16xf32>
    %1 = vector.shape_cast %0 : vector<1x4x16x16xf32> to vector<4x16x16xf32>
    %c0_3 = arith.constant 0 : index
    %c0_4 = arith.constant 0 : index
    %c0_5 = arith.constant 0 : index
    %2 = vector.load %arg6[%c0_3, %c0_4, %c0_5] : memref<1x4x16xf32, #tpu.memory_space<vmem>>, vector<1x4x16xf32>
    %3 = vector.shape_cast %2 : vector<1x4x16xf32> to vector<4x16xf32>
    %c0_6 = arith.constant 0 : index
    %c0_7 = arith.constant 0 : index
    %c0_8 = arith.constant 0 : index
    %4 = vector.load %arg10[%c0_6, %c0_7, %c0_8] : memref<1x4x16xf32, #tpu.memory_space<vmem>>, vector<1x4x16xf32>
    %5 = vector.shape_cast %4 : vector<1x4x16xf32> to vector<4x16xf32>
    %6 = vector.shape_cast %3 : vector<4x16xf32> to vector<1x4x16xf32>
    %7 = vector.shape_cast %6 : vector<1x4x16xf32> to vector<1x4x16xf32>
    %8 = vector.broadcast %7 : vector<1x4x16xf32> to vector<4x4x16xf32>
    %cst = arith.constant dense<0.000000e+00> : vector<4x4x16xf32>
    %9 = tpu.matmul %8, %1, %cst {dimension_numbers = #tpu.dot_dimension_numbers<[2], [1], [1], [2], [0, 0, 0, 1, 1, 2], [0], [0]>} : vector<4x4x16xf32>, vector<4x16x16xf32>, vector<4x4x16xf32> -> vector<4x4x16xf32>
    %10 = vector.extract_strided_slice %9 {offsets = [0, 0, 0], sizes = [4, 1, 16], strides = [1, 1, 1]} : vector<4x4x16xf32> to vector<4x1x16xf32>
    %11 = vector.shape_cast %10 : vector<4x1x16xf32> to vector<4x16xf32>
    %cst_9 = arith.constant dense<0.000000e+00> : vector<4x4xf32>
    %12 = tpu.matmul %5, %11, %cst_9 {dimension_numbers = #tpu.dot_dimension_numbers<[1], [1], [0], [0], [0, 0, 1, 0], [], []>} : vector<4x16xf32>, vector<4x16xf32>, vector<4x4xf32> -> vector<4x4xf32>
    %13 = vector.extract_strided_slice %9 {offsets = [0, 1, 0], sizes = [4, 1, 16], strides = [1, 1, 1]} : vector<4x4x16xf32> to vector<4x1x16xf32>
    %14 = vector.shape_cast %13 : vector<4x1x16xf32> to vector<4x16xf32>
    %cst_10 = arith.constant dense<0.000000e+00> : vector<4x4xf32>
    %15 = tpu.matmul %5, %14, %cst_10 {dimension_numbers = #tpu.dot_dimension_numbers<[1], [1], [0], [0], [0, 0, 1, 0], [], []>} : vector<4x16xf32>, vector<4x16xf32>, vector<4x4xf32> -> vector<4x4xf32>
    %16 = vector.extract_strided_slice %9 {offsets = [0, 2, 0], sizes = [4, 1, 16], strides = [1, 1, 1]} : vector<4x4x16xf32> to vector<4x1x16xf32>
    %17 = vector.shape_cast %16 : vector<4x1x16xf32> to vector<4x16xf32>
    %cst_11 = arith.constant dense<0.000000e+00> : vector<4x4xf32>
    %18 = tpu.matmul %5, %17, %cst_11 {dimension_numbers = #tpu.dot_dimension_numbers<[1], [1], [0], [0], [0, 0, 1, 0], [], []>} : vector<4x16xf32>, vector<4x16xf32>, vector<4x4xf32> -> vector<4x4xf32>
    %19 = vector.extract_strided_slice %9 {offsets = [0, 3, 0], sizes = [4, 1, 16], strides = [1, 1, 1]} : vector<4x4x16xf32> to vector<4x1x16xf32>
    %20 = vector.shape_cast %19 : vector<4x1x16xf32> to vector<4x16xf32>
    %cst_12 = arith.constant dense<0.000000e+00> : vector<4x4xf32>
    %21 = tpu.matmul %5, %20, %cst_12 {dimension_numbers = #tpu.dot_dimension_numbers<[1], [1], [0], [0], [0, 0, 1, 0], [], []>} : vector<4x16xf32>, vector<4x16xf32>, vector<4x4xf32> -> vector<4x4xf32>
    %22 = tpu.concatenate %12, %15, %18, %21 in 0 : vector<4x4xf32>, vector<4x4xf32>, vector<4x4xf32>, vector<4x4xf32> -> vector<16x4xf32>
    %c0_13 = arith.constant 0 : index
    %c0_14 = arith.constant 0 : index
    %c0_15 = arith.constant 0 : index
    %c0_16 = arith.constant 0 : index
    %23 = vector.load %arg3[%c0_13, %c0_14, %c0_15, %c0_16] : memref<1x4x8x8xf32, #tpu.memory_space<vmem>>, vector<1x4x8x8xf32>
    %24 = vector.shape_cast %23 : vector<1x4x8x8xf32> to vector<4x8x8xf32>
    %c0_17 = arith.constant 0 : index
    %c0_18 = arith.constant 0 : index
    %c0_19 = arith.constant 0 : index
    %25 = vector.load %arg7[%c0_17, %c0_18, %c0_19] : memref<1x4x8xf32, #tpu.memory_space<vmem>>, vector<1x4x8xf32>
    %26 = vector.shape_cast %25 : vector<1x4x8xf32> to vector<4x8xf32>
    %c0_20 = arith.constant 0 : index
    %c0_21 = arith.constant 0 : index
    %c0_22 = arith.constant 0 : index
    %27 = vector.load %arg11[%c0_20, %c0_21, %c0_22] : memref<1x4x8xf32, #tpu.memory_space<vmem>>, vector<1x4x8xf32>
    %28 = vector.shape_cast %27 : vector<1x4x8xf32> to vector<4x8xf32>
    %29 = vector.shape_cast %26 : vector<4x8xf32> to vector<1x4x8xf32>
    %30 = vector.shape_cast %29 : vector<1x4x8xf32> to vector<1x4x8xf32>
    %31 = vector.broadcast %30 : vector<1x4x8xf32> to vector<4x4x8xf32>
    %cst_23 = arith.constant dense<0.000000e+00> : vector<4x4x8xf32>
    %32 = tpu.matmul %31, %24, %cst_23 {dimension_numbers = #tpu.dot_dimension_numbers<[2], [1], [1], [2], [0, 0, 0, 1, 1, 2], [0], [0]>} : vector<4x4x8xf32>, vector<4x8x8xf32>, vector<4x4x8xf32> -> vector<4x4x8xf32>
    %33 = vector.extract_strided_slice %32 {offsets = [0, 0, 0], sizes = [4, 1, 8], strides = [1, 1, 1]} : vector<4x4x8xf32> to vector<4x1x8xf32>
    %34 = vector.shape_cast %33 : vector<4x1x8xf32> to vector<4x8xf32>
    %cst_24 = arith.constant dense<0.000000e+00> : vector<4x4xf32>
    %35 = tpu.matmul %28, %34, %cst_24 {dimension_numbers = #tpu.dot_dimension_numbers<[1], [1], [0], [0], [0, 0, 1, 0], [], []>} : vector<4x8xf32>, vector<4x8xf32>, vector<4x4xf32> -> vector<4x4xf32>
    %36 = vector.extract_strided_slice %32 {offsets = [0, 1, 0], sizes = [4, 1, 8], strides = [1, 1, 1]} : vector<4x4x8xf32> to vector<4x1x8xf32>
    %37 = vector.shape_cast %36 : vector<4x1x8xf32> to vector<4x8xf32>
    %cst_25 = arith.constant dense<0.000000e+00> : vector<4x4xf32>
    %38 = tpu.matmul %28, %37, %cst_25 {dimension_numbers = #tpu.dot_dimension_numbers<[1], [1], [0], [0], [0, 0, 1, 0], [], []>} : vector<4x8xf32>, vector<4x8xf32>, vector<4x4xf32> -> vector<4x4xf32>
    %39 = vector.extract_strided_slice %32 {offsets = [0, 2, 0], sizes = [4, 1, 8], strides = [1, 1, 1]} : vector<4x4x8xf32> to vector<4x1x8xf32>
    %40 = vector.shape_cast %39 : vector<4x1x8xf32> to vector<4x8xf32>
    %cst_26 = arith.constant dense<0.000000e+00> : vector<4x4xf32>
    %41 = tpu.matmul %28, %40, %cst_26 {dimension_numbers = #tpu.dot_dimension_numbers<[1], [1], [0], [0], [0, 0, 1, 0], [], []>} : vector<4x8xf32>, vector<4x8xf32>, vector<4x4xf32> -> vector<4x4xf32>
    %42 = vector.extract_strided_slice %32 {offsets = [0, 3, 0], sizes = [4, 1, 8], strides = [1, 1, 1]} : vector<4x4x8xf32> to vector<4x1x8xf32>
    %43 = vector.shape_cast %42 : vector<4x1x8xf32> to vector<4x8xf32>
    %cst_27 = arith.constant dense<0.000000e+00> : vector<4x4xf32>
    %44 = tpu.matmul %28, %43, %cst_27 {dimension_numbers = #tpu.dot_dimension_numbers<[1], [1], [0], [0], [0, 0, 1, 0], [], []>} : vector<4x8xf32>, vector<4x8xf32>, vector<4x4xf32> -> vector<4x4xf32>
    %45 = tpu.concatenate %35, %38, %41, %44 in 0 : vector<4x4xf32>, vector<4x4xf32>, vector<4x4xf32>, vector<4x4xf32> -> vector<16x4xf32>
    %c0_28 = arith.constant 0 : index
    %c0_29 = arith.constant 0 : index
    %c0_30 = arith.constant 0 : index
    %c0_31 = arith.constant 0 : index
    %46 = vector.load %arg4[%c0_28, %c0_29, %c0_30, %c0_31] : memref<1x4x4x4xf32, #tpu.memory_space<vmem>>, vector<1x4x4x4xf32>
    %47 = vector.shape_cast %46 : vector<1x4x4x4xf32> to vector<4x4x4xf32>
    %c0_32 = arith.constant 0 : index
    %c0_33 = arith.constant 0 : index
    %c0_34 = arith.constant 0 : index
    %48 = vector.load %arg8[%c0_32, %c0_33, %c0_34] : memref<1x4x4xf32, #tpu.memory_space<vmem>>, vector<1x4x4xf32>
    %49 = vector.shape_cast %48 : vector<1x4x4xf32> to vector<4x4xf32>
    %c0_35 = arith.constant 0 : index
    %c0_36 = arith.constant 0 : index
    %c0_37 = arith.constant 0 : index
    %50 = vector.load %arg12[%c0_35, %c0_36, %c0_37] : memref<1x4x4xf32, #tpu.memory_space<vmem>>, vector<1x4x4xf32>
    %51 = vector.shape_cast %50 : vector<1x4x4xf32> to vector<4x4xf32>
    %52 = vector.shape_cast %49 : vector<4x4xf32> to vector<1x4x4xf32>
    %53 = vector.shape_cast %52 : vector<1x4x4xf32> to vector<1x4x4xf32>
    %54 = vector.broadcast %53 : vector<1x4x4xf32> to vector<4x4x4xf32>
    %cst_38 = arith.constant dense<0.000000e+00> : vector<4x4x4xf32>
    %55 = tpu.matmul %54, %47, %cst_38 {dimension_numbers = #tpu.dot_dimension_numbers<[2], [1], [1], [2], [0, 0, 0, 1, 1, 2], [0], [0]>} : vector<4x4x4xf32>, vector<4x4x4xf32>, vector<4x4x4xf32> -> vector<4x4x4xf32>
    %56 = vector.extract_strided_slice %55 {offsets = [0, 0, 0], sizes = [4, 1, 4], strides = [1, 1, 1]} : vector<4x4x4xf32> to vector<4x1x4xf32>
    %57 = vector.shape_cast %56 : vector<4x1x4xf32> to vector<4x4xf32>
    %cst_39 = arith.constant dense<0.000000e+00> : vector<4x4xf32>
    %58 = tpu.matmul %51, %57, %cst_39 {dimension_numbers = #tpu.dot_dimension_numbers<[1], [1], [0], [0], [0, 0, 1, 0], [], []>} : vector<4x4xf32>, vector<4x4xf32>, vector<4x4xf32> -> vector<4x4xf32>
    %59 = vector.extract_strided_slice %55 {offsets = [0, 1, 0], sizes = [4, 1, 4], strides = [1, 1, 1]} : vector<4x4x4xf32> to vector<4x1x4xf32>
    %60 = vector.shape_cast %59 : vector<4x1x4xf32> to vector<4x4xf32>
    %cst_40 = arith.constant dense<0.000000e+00> : vector<4x4xf32>
    %61 = tpu.matmul %51, %60, %cst_40 {dimension_numbers = #tpu.dot_dimension_numbers<[1], [1], [0], [0], [0, 0, 1, 0], [], []>} : vector<4x4xf32>, vector<4x4xf32>, vector<4x4xf32> -> vector<4x4xf32>
    %62 = vector.extract_strided_slice %55 {offsets = [0, 2, 0], sizes = [4, 1, 4], strides = [1, 1, 1]} : vector<4x4x4xf32> to vector<4x1x4xf32>
    %63 = vector.shape_cast %62 : vector<4x1x4xf32> to vector<4x4xf32>
    %cst_41 = arith.constant dense<0.000000e+00> : vector<4x4xf32>
    %64 = tpu.matmul %51, %63, %cst_41 {dimension_numbers = #tpu.dot_dimension_numbers<[1], [1], [0], [0], [0, 0, 1, 0], [], []>} : vector<4x4xf32>, vector<4x4xf32>, vector<4x4xf32> -> vector<4x4xf32>
    %65 = vector.extract_strided_slice %55 {offsets = [0, 3, 0], sizes = [4, 1, 4], strides = [1, 1, 1]} : vector<4x4x4xf32> to vector<4x1x4xf32>
    %66 = vector.shape_cast %65 : vector<4x1x4xf32> to vector<4x4xf32>
    %cst_42 = arith.constant dense<0.000000e+00> : vector<4x4xf32>
    %67 = tpu.matmul %51, %66, %cst_42 {dimension_numbers = #tpu.dot_dimension_numbers<[1], [1], [0], [0], [0, 0, 1, 0], [], []>} : vector<4x4xf32>, vector<4x4xf32>, vector<4x4xf32> -> vector<4x4xf32>
    %68 = tpu.concatenate %58, %61, %64, %67 in 0 : vector<4x4xf32>, vector<4x4xf32>, vector<4x4xf32>, vector<4x4xf32> -> vector<16x4xf32>
    %c0_43 = arith.constant 0 : index
    %c0_44 = arith.constant 0 : index
    %c0_45 = arith.constant 0 : index
    %c0_46 = arith.constant 0 : index
    %69 = vector.load %arg5[%c0_43, %c0_44, %c0_45, %c0_46] : memref<1x4x2x2xf32, #tpu.memory_space<vmem>>, vector<1x4x2x2xf32>
    %70 = vector.shape_cast %69 : vector<1x4x2x2xf32> to vector<4x2x2xf32>
    %c0_47 = arith.constant 0 : index
    %c0_48 = arith.constant 0 : index
    %c0_49 = arith.constant 0 : index
    %71 = vector.load %arg9[%c0_47, %c0_48, %c0_49] : memref<1x4x2xf32, #tpu.memory_space<vmem>>, vector<1x4x2xf32>
    %72 = vector.shape_cast %71 : vector<1x4x2xf32> to vector<4x2xf32>
    %c0_50 = arith.constant 0 : index
    %c0_51 = arith.constant 0 : index
    %c0_52 = arith.constant 0 : index
    %73 = vector.load %arg13[%c0_50, %c0_51, %c0_52] : memref<1x4x2xf32, #tpu.memory_space<vmem>>, vector<1x4x2xf32>
    %74 = vector.shape_cast %73 : vector<1x4x2xf32> to vector<4x2xf32>
    %75 = vector.shape_cast %72 : vector<4x2xf32> to vector<1x4x2xf32>
    %76 = vector.shape_cast %75 : vector<1x4x2xf32> to vector<1x4x2xf32>
    %77 = vector.broadcast %76 : vector<1x4x2xf32> to vector<4x4x2xf32>
    %cst_53 = arith.constant dense<0.000000e+00> : vector<4x4x2xf32>
    %78 = tpu.matmul %77, %70, %cst_53 {dimension_numbers = #tpu.dot_dimension_numbers<[2], [1], [1], [2], [0, 0, 0, 1, 1, 2], [0], [0]>} : vector<4x4x2xf32>, vector<4x2x2xf32>, vector<4x4x2xf32> -> vector<4x4x2xf32>
    %79 = vector.extract_strided_slice %78 {offsets = [0, 0, 0], sizes = [4, 1, 2], strides = [1, 1, 1]} : vector<4x4x2xf32> to vector<4x1x2xf32>
    %80 = vector.shape_cast %79 : vector<4x1x2xf32> to vector<4x2xf32>
    %cst_54 = arith.constant dense<0.000000e+00> : vector<4x4xf32>
    %81 = tpu.matmul %74, %80, %cst_54 {dimension_numbers = #tpu.dot_dimension_numbers<[1], [1], [0], [0], [0, 0, 1, 0], [], []>} : vector<4x2xf32>, vector<4x2xf32>, vector<4x4xf32> -> vector<4x4xf32>
    %82 = vector.extract_strided_slice %78 {offsets = [0, 1, 0], sizes = [4, 1, 2], strides = [1, 1, 1]} : vector<4x4x2xf32> to vector<4x1x2xf32>
    %83 = vector.shape_cast %82 : vector<4x1x2xf32> to vector<4x2xf32>
    %cst_55 = arith.constant dense<0.000000e+00> : vector<4x4xf32>
    %84 = tpu.matmul %74, %83, %cst_55 {dimension_numbers = #tpu.dot_dimension_numbers<[1], [1], [0], [0], [0, 0, 1, 0], [], []>} : vector<4x2xf32>, vector<4x2xf32>, vector<4x4xf32> -> vector<4x4xf32>
    %85 = vector.extract_strided_slice %78 {offsets = [0, 2, 0], sizes = [4, 1, 2], strides = [1, 1, 1]} : vector<4x4x2xf32> to vector<4x1x2xf32>
    %86 = vector.shape_cast %85 : vector<4x1x2xf32> to vector<4x2xf32>
    %cst_56 = arith.constant dense<0.000000e+00> : vector<4x4xf32>
    %87 = tpu.matmul %74, %86, %cst_56 {dimension_numbers = #tpu.dot_dimension_numbers<[1], [1], [0], [0], [0, 0, 1, 0], [], []>} : vector<4x2xf32>, vector<4x2xf32>, vector<4x4xf32> -> vector<4x4xf32>
    %88 = vector.extract_strided_slice %78 {offsets = [0, 3, 0], sizes = [4, 1, 2], strides = [1, 1, 1]} : vector<4x4x2xf32> to vector<4x1x2xf32>
    %89 = vector.shape_cast %88 : vector<4x1x2xf32> to vector<4x2xf32>
    %cst_57 = arith.constant dense<0.000000e+00> : vector<4x4xf32>
    %90 = tpu.matmul %74, %89, %cst_57 {dimension_numbers = #tpu.dot_dimension_numbers<[1], [1], [0], [0], [0, 0, 1, 0], [], []>} : vector<4x2xf32>, vector<4x2xf32>, vector<4x4xf32> -> vector<4x4xf32>
    %91 = tpu.concatenate %81, %84, %87, %90 in 0 : vector<4x4xf32>, vector<4x4xf32>, vector<4x4xf32>, vector<4x4xf32> -> vector<16x4xf32>
    %c0_58 = arith.constant 0 : index
    %c0_59 = arith.constant 0 : index
    %92 = vector.load %arg15[%c0_58, %c0_59] : memref<1x4xf32, #tpu.memory_space<vmem>>, vector<1x4xf32>
    %c0_60 = arith.constant 0 : index
    %c0_61 = arith.constant 0 : index
    %c0_62 = arith.constant 0 : index
    %93 = vector.load %arg14[%c0_60, %c0_61, %c0_62] : memref<4x4x4xf32, #tpu.memory_space<vmem>>, vector<1x4x4xf32>
    %94 = vector.shape_cast %93 : vector<1x4x4xf32> to vector<4x4xf32>
    %cst_63 = arith.constant dense<0.000000e+00> : vector<16x4xf32>
    %95 = tpu.matmul %22, %94, %cst_63 {dimension_numbers = #tpu.dot_dimension_numbers<[1], [0], [0], [1], [0, 0, 1, 1], [], []>} : vector<16x4xf32>, vector<4x4xf32>, vector<16x4xf32> -> vector<16x4xf32>
    %96 = vector.broadcast %92 : vector<1x4xf32> to vector<16x4xf32>
    %97 = arith.addf %96, %95 : vector<16x4xf32>
    %c1 = arith.constant 1 : index
    %c0_64 = arith.constant 0 : index
    %c0_65 = arith.constant 0 : index
    %98 = vector.load %arg14[%c1, %c0_64, %c0_65] : memref<4x4x4xf32, #tpu.memory_space<vmem>>, vector<1x4x4xf32>
    %99 = vector.shape_cast %98 : vector<1x4x4xf32> to vector<4x4xf32>
    %cst_66 = arith.constant dense<0.000000e+00> : vector<16x4xf32>
    %100 = tpu.matmul %45, %99, %cst_66 {dimension_numbers = #tpu.dot_dimension_numbers<[1], [0], [0], [1], [0, 0, 1, 1], [], []>} : vector<16x4xf32>, vector<4x4xf32>, vector<16x4xf32> -> vector<16x4xf32>
    %101 = arith.addf %97, %100 : vector<16x4xf32>
    %c2 = arith.constant 2 : index
    %c0_67 = arith.constant 0 : index
    %c0_68 = arith.constant 0 : index
    %102 = vector.load %arg14[%c2, %c0_67, %c0_68] : memref<4x4x4xf32, #tpu.memory_space<vmem>>, vector<1x4x4xf32>
    %103 = vector.shape_cast %102 : vector<1x4x4xf32> to vector<4x4xf32>
    %cst_69 = arith.constant dense<0.000000e+00> : vector<16x4xf32>
    %104 = tpu.matmul %68, %103, %cst_69 {dimension_numbers = #tpu.dot_dimension_numbers<[1], [0], [0], [1], [0, 0, 1, 1], [], []>} : vector<16x4xf32>, vector<4x4xf32>, vector<16x4xf32> -> vector<16x4xf32>
    %105 = arith.addf %101, %104 : vector<16x4xf32>
    %c3 = arith.constant 3 : index
    %c0_70 = arith.constant 0 : index
    %c0_71 = arith.constant 0 : index
    %106 = vector.load %arg14[%c3, %c0_70, %c0_71] : memref<4x4x4xf32, #tpu.memory_space<vmem>>, vector<1x4x4xf32>
    %107 = vector.shape_cast %106 : vector<1x4x4xf32> to vector<4x4xf32>
    %cst_72 = arith.constant dense<0.000000e+00> : vector<16x4xf32>
    %108 = tpu.matmul %91, %107, %cst_72 {dimension_numbers = #tpu.dot_dimension_numbers<[1], [0], [0], [1], [0, 0, 1, 1], [], []>} : vector<16x4xf32>, vector<4x4xf32>, vector<16x4xf32> -> vector<16x4xf32>
    %109 = arith.addf %105, %108 : vector<16x4xf32>
    %cst_73 = arith.constant 0.000000e+00 : f32
    %110 = vector.broadcast %cst_73 : f32 to vector<16x4xf32>
    %111 = arith.maximumf %109, %110 : vector<16x4xf32>
    %cst_74 = arith.constant 0.000000e+00 : f32
    %112 = vector.broadcast %cst_74 : f32 to vector<5x4xf32>
    %113 = tpu.concatenate %112, %111, %112 in 0 : vector<5x4xf32>, vector<16x4xf32>, vector<5x4xf32> -> vector<26x4xf32>
    %c0_75 = arith.constant 0 : index
    %c0_76 = arith.constant 0 : index
    %114 = vector.load %arg17[%c0_75, %c0_76] : memref<1x4xf32, #tpu.memory_space<vmem>>, vector<1x4xf32>
    %115 = vector.extract_strided_slice %113 {offsets = [0, 0], sizes = [16, 4], strides = [1, 1]} : vector<26x4xf32> to vector<16x4xf32>
    %c0_77 = arith.constant 0 : index
    %c0_78 = arith.constant 0 : index
    %116 = vector.load %arg18[%c0_77, %c0_78] : memref<16x2xf32, #tpu.memory_space<vmem>>, vector<16x1xf32>
    %117 = vector.broadcast %116 : vector<16x1xf32> to vector<16x4xf32>
    %118 = arith.mulf %115, %117 : vector<16x4xf32>
    %c0_79 = arith.constant 0 : index
    %c0_80 = arith.constant 0 : index
    %c0_81 = arith.constant 0 : index
    %119 = vector.load %arg16[%c0_79, %c0_80, %c0_81] : memref<9x4x4xf32, #tpu.memory_space<vmem>>, vector<1x4x4xf32>
    %120 = vector.shape_cast %119 : vector<1x4x4xf32> to vector<4x4xf32>
    %cst_82 = arith.constant dense<0.000000e+00> : vector<16x4xf32>
    %121 = tpu.matmul %118, %120, %cst_82 {dimension_numbers = #tpu.dot_dimension_numbers<[1], [0], [0], [1], [0, 0, 1, 1], [], []>} : vector<16x4xf32>, vector<4x4xf32>, vector<16x4xf32> -> vector<16x4xf32>
    %122 = vector.broadcast %114 : vector<1x4xf32> to vector<16x4xf32>
    %123 = arith.addf %122, %121 : vector<16x4xf32>
    %124 = vector.extract_strided_slice %113 {offsets = [1, 0], sizes = [16, 4], strides = [1, 1]} : vector<26x4xf32> to vector<16x4xf32>
    %c1_83 = arith.constant 1 : index
    %c0_84 = arith.constant 0 : index
    %c0_85 = arith.constant 0 : index
    %125 = vector.load %arg16[%c1_83, %c0_84, %c0_85] : memref<9x4x4xf32, #tpu.memory_space<vmem>>, vector<1x4x4xf32>
    %126 = vector.shape_cast %125 : vector<1x4x4xf32> to vector<4x4xf32>
    %cst_86 = arith.constant dense<0.000000e+00> : vector<16x4xf32>
    %127 = tpu.matmul %124, %126, %cst_86 {dimension_numbers = #tpu.dot_dimension_numbers<[1], [0], [0], [1], [0, 0, 1, 1], [], []>} : vector<16x4xf32>, vector<4x4xf32>, vector<16x4xf32> -> vector<16x4xf32>
    %128 = arith.addf %123, %127 : vector<16x4xf32>
    %129 = vector.extract_strided_slice %113 {offsets = [2, 0], sizes = [16, 4], strides = [1, 1]} : vector<26x4xf32> to vector<16x4xf32>
    %c0_87 = arith.constant 0 : index
    %c1_88 = arith.constant 1 : index
    %130 = vector.load %arg18[%c0_87, %c1_88] : memref<16x2xf32, #tpu.memory_space<vmem>>, vector<16x1xf32>
    %131 = vector.broadcast %130 : vector<16x1xf32> to vector<16x4xf32>
    %132 = arith.mulf %129, %131 : vector<16x4xf32>
    %c2_89 = arith.constant 2 : index
    %c0_90 = arith.constant 0 : index
    %c0_91 = arith.constant 0 : index
    %133 = vector.load %arg16[%c2_89, %c0_90, %c0_91] : memref<9x4x4xf32, #tpu.memory_space<vmem>>, vector<1x4x4xf32>
    %134 = vector.shape_cast %133 : vector<1x4x4xf32> to vector<4x4xf32>
    %cst_92 = arith.constant dense<0.000000e+00> : vector<16x4xf32>
    %135 = tpu.matmul %132, %134, %cst_92 {dimension_numbers = #tpu.dot_dimension_numbers<[1], [0], [0], [1], [0, 0, 1, 1], [], []>} : vector<16x4xf32>, vector<4x4xf32>, vector<16x4xf32> -> vector<16x4xf32>
    %136 = arith.addf %128, %135 : vector<16x4xf32>
    %137 = vector.extract_strided_slice %113 {offsets = [4, 0], sizes = [16, 4], strides = [1, 1]} : vector<26x4xf32> to vector<16x4xf32>
    %c0_93 = arith.constant 0 : index
    %c0_94 = arith.constant 0 : index
    %138 = vector.load %arg18[%c0_93, %c0_94] : memref<16x2xf32, #tpu.memory_space<vmem>>, vector<16x1xf32>
    %139 = vector.broadcast %138 : vector<16x1xf32> to vector<16x4xf32>
    %140 = arith.mulf %137, %139 : vector<16x4xf32>
    %c3_95 = arith.constant 3 : index
    %c0_96 = arith.constant 0 : index
    %c0_97 = arith.constant 0 : index
    %141 = vector.load %arg16[%c3_95, %c0_96, %c0_97] : memref<9x4x4xf32, #tpu.memory_space<vmem>>, vector<1x4x4xf32>
    %142 = vector.shape_cast %141 : vector<1x4x4xf32> to vector<4x4xf32>
    %cst_98 = arith.constant dense<0.000000e+00> : vector<16x4xf32>
    %143 = tpu.matmul %140, %142, %cst_98 {dimension_numbers = #tpu.dot_dimension_numbers<[1], [0], [0], [1], [0, 0, 1, 1], [], []>} : vector<16x4xf32>, vector<4x4xf32>, vector<16x4xf32> -> vector<16x4xf32>
    %144 = arith.addf %136, %143 : vector<16x4xf32>
    %145 = vector.extract_strided_slice %113 {offsets = [5, 0], sizes = [16, 4], strides = [1, 1]} : vector<26x4xf32> to vector<16x4xf32>
    %c4 = arith.constant 4 : index
    %c0_99 = arith.constant 0 : index
    %c0_100 = arith.constant 0 : index
    %146 = vector.load %arg16[%c4, %c0_99, %c0_100] : memref<9x4x4xf32, #tpu.memory_space<vmem>>, vector<1x4x4xf32>
    %147 = vector.shape_cast %146 : vector<1x4x4xf32> to vector<4x4xf32>
    %cst_101 = arith.constant dense<0.000000e+00> : vector<16x4xf32>
    %148 = tpu.matmul %145, %147, %cst_101 {dimension_numbers = #tpu.dot_dimension_numbers<[1], [0], [0], [1], [0, 0, 1, 1], [], []>} : vector<16x4xf32>, vector<4x4xf32>, vector<16x4xf32> -> vector<16x4xf32>
    %149 = arith.addf %144, %148 : vector<16x4xf32>
    %150 = vector.extract_strided_slice %113 {offsets = [6, 0], sizes = [16, 4], strides = [1, 1]} : vector<26x4xf32> to vector<16x4xf32>
    %c0_102 = arith.constant 0 : index
    %c1_103 = arith.constant 1 : index
    %151 = vector.load %arg18[%c0_102, %c1_103] : memref<16x2xf32, #tpu.memory_space<vmem>>, vector<16x1xf32>
    %152 = vector.broadcast %151 : vector<16x1xf32> to vector<16x4xf32>
    %153 = arith.mulf %150, %152 : vector<16x4xf32>
    %c5 = arith.constant 5 : index
    %c0_104 = arith.constant 0 : index
    %c0_105 = arith.constant 0 : index
    %154 = vector.load %arg16[%c5, %c0_104, %c0_105] : memref<9x4x4xf32, #tpu.memory_space<vmem>>, vector<1x4x4xf32>
    %155 = vector.shape_cast %154 : vector<1x4x4xf32> to vector<4x4xf32>
    %cst_106 = arith.constant dense<0.000000e+00> : vector<16x4xf32>
    %156 = tpu.matmul %153, %155, %cst_106 {dimension_numbers = #tpu.dot_dimension_numbers<[1], [0], [0], [1], [0, 0, 1, 1], [], []>} : vector<16x4xf32>, vector<4x4xf32>, vector<16x4xf32> -> vector<16x4xf32>
    %157 = arith.addf %149, %156 : vector<16x4xf32>
    %158 = vector.extract_strided_slice %113 {offsets = [8, 0], sizes = [16, 4], strides = [1, 1]} : vector<26x4xf32> to vector<16x4xf32>
    %c0_107 = arith.constant 0 : index
    %c0_108 = arith.constant 0 : index
    %159 = vector.load %arg18[%c0_107, %c0_108] : memref<16x2xf32, #tpu.memory_space<vmem>>, vector<16x1xf32>
    %160 = vector.broadcast %159 : vector<16x1xf32> to vector<16x4xf32>
    %161 = arith.mulf %158, %160 : vector<16x4xf32>
    %c6 = arith.constant 6 : index
    %c0_109 = arith.constant 0 : index
    %c0_110 = arith.constant 0 : index
    %162 = vector.load %arg16[%c6, %c0_109, %c0_110] : memref<9x4x4xf32, #tpu.memory_space<vmem>>, vector<1x4x4xf32>
    %163 = vector.shape_cast %162 : vector<1x4x4xf32> to vector<4x4xf32>
    %cst_111 = arith.constant dense<0.000000e+00> : vector<16x4xf32>
    %164 = tpu.matmul %161, %163, %cst_111 {dimension_numbers = #tpu.dot_dimension_numbers<[1], [0], [0], [1], [0, 0, 1, 1], [], []>} : vector<16x4xf32>, vector<4x4xf32>, vector<16x4xf32> -> vector<16x4xf32>
    %165 = arith.addf %157, %164 : vector<16x4xf32>
    %166 = vector.extract_strided_slice %113 {offsets = [9, 0], sizes = [16, 4], strides = [1, 1]} : vector<26x4xf32> to vector<16x4xf32>
    %c7 = arith.constant 7 : index
    %c0_112 = arith.constant 0 : index
    %c0_113 = arith.constant 0 : index
    %167 = vector.load %arg16[%c7, %c0_112, %c0_113] : memref<9x4x4xf32, #tpu.memory_space<vmem>>, vector<1x4x4xf32>
    %168 = vector.shape_cast %167 : vector<1x4x4xf32> to vector<4x4xf32>
    %cst_114 = arith.constant dense<0.000000e+00> : vector<16x4xf32>
    %169 = tpu.matmul %166, %168, %cst_114 {dimension_numbers = #tpu.dot_dimension_numbers<[1], [0], [0], [1], [0, 0, 1, 1], [], []>} : vector<16x4xf32>, vector<4x4xf32>, vector<16x4xf32> -> vector<16x4xf32>
    %170 = arith.addf %165, %169 : vector<16x4xf32>
    %171 = vector.extract_strided_slice %113 {offsets = [10, 0], sizes = [16, 4], strides = [1, 1]} : vector<26x4xf32> to vector<16x4xf32>
    %c0_115 = arith.constant 0 : index
    %c1_116 = arith.constant 1 : index
    %172 = vector.load %arg18[%c0_115, %c1_116] : memref<16x2xf32, #tpu.memory_space<vmem>>, vector<16x1xf32>
    %173 = vector.broadcast %172 : vector<16x1xf32> to vector<16x4xf32>
    %174 = arith.mulf %171, %173 : vector<16x4xf32>
    %c8 = arith.constant 8 : index
    %c0_117 = arith.constant 0 : index
    %c0_118 = arith.constant 0 : index
    %175 = vector.load %arg16[%c8, %c0_117, %c0_118] : memref<9x4x4xf32, #tpu.memory_space<vmem>>, vector<1x4x4xf32>
    %176 = vector.shape_cast %175 : vector<1x4x4xf32> to vector<4x4xf32>
    %cst_119 = arith.constant dense<0.000000e+00> : vector<16x4xf32>
    %177 = tpu.matmul %174, %176, %cst_119 {dimension_numbers = #tpu.dot_dimension_numbers<[1], [0], [0], [1], [0, 0, 1, 1], [], []>} : vector<16x4xf32>, vector<4x4xf32>, vector<16x4xf32> -> vector<16x4xf32>
    %178 = arith.addf %170, %177 : vector<16x4xf32>
    %cst_120 = arith.constant 0.000000e+00 : f32
    %179 = vector.broadcast %cst_120 : f32 to vector<16x4xf32>
    %180 = arith.subf %179, %178 : vector<16x4xf32>
    %181 = math.exp %180 : vector<16x4xf32>
    %cst_121 = arith.constant 1.000000e+00 : f32
    %182 = vector.broadcast %cst_121 : f32 to vector<16x4xf32>
    %183 = arith.addf %182, %181 : vector<16x4xf32>
    %cst_122 = arith.constant 1.000000e+00 : f32
    %184 = vector.broadcast %cst_122 : f32 to vector<16x4xf32>
    %185 = arith.divf %184, %183 : vector<16x4xf32>
    %186 = vector.extract_strided_slice %185 {offsets = [0, 0], sizes = [16, 1], strides = [1, 1]} : vector<16x4xf32> to vector<16x1xf32>
    %187 = vector.broadcast %186 : vector<16x1xf32> to vector<16x4xf32>
    %188 = arith.mulf %187, %22 : vector<16x4xf32>
    %189 = vector.extract_strided_slice %185 {offsets = [0, 1], sizes = [16, 1], strides = [1, 1]} : vector<16x4xf32> to vector<16x1xf32>
    %190 = vector.broadcast %189 : vector<16x1xf32> to vector<16x4xf32>
    %191 = arith.mulf %190, %45 : vector<16x4xf32>
    %192 = arith.addf %188, %191 : vector<16x4xf32>
    %193 = vector.extract_strided_slice %185 {offsets = [0, 2], sizes = [16, 1], strides = [1, 1]} : vector<16x4xf32> to vector<16x1xf32>
    %194 = vector.broadcast %193 : vector<16x1xf32> to vector<16x4xf32>
    %195 = arith.mulf %194, %68 : vector<16x4xf32>
    %196 = arith.addf %192, %195 : vector<16x4xf32>
    %197 = vector.extract_strided_slice %185 {offsets = [0, 3], sizes = [16, 1], strides = [1, 1]} : vector<16x4xf32> to vector<16x1xf32>
    %198 = vector.broadcast %197 : vector<16x1xf32> to vector<16x4xf32>
    %199 = arith.mulf %198, %91 : vector<16x4xf32>
    %200 = arith.addf %196, %199 : vector<16x4xf32>
    %c0_123 = arith.constant 0 : index
    %c0_124 = arith.constant 0 : index
    %c0_125 = arith.constant 0 : index
    %201 = vector.load %arg19[%c0_123, %c0_124, %c0_125] : memref<1x16x4xf32, #tpu.memory_space<vmem>>, vector<1x16x4xf32>
    %202 = vector.shape_cast %201 : vector<1x16x4xf32> to vector<16x4xf32>
    %203 = vector.shape_cast %200 : vector<16x4xf32> to vector<1x16x4xf32>
    tpu.vector_store %arg19[%c0_123, %c0_124, %c0_125], %203 {strides = array<i32>} : memref<1x16x4xf32, #tpu.memory_space<vmem>>, vector<1x16x4xf32>,
    return
  }
  func.func @transform_0(%arg0: i32, %arg1: memref<8xi32, #tpu.memory_space<smem>>) -> (i32, i32, i32, i32) {
    %0 = arith.index_cast %arg0 : i32 to index
    %1 = memref.load %arg1[%0] : memref<8xi32, #tpu.memory_space<smem>>
    %c0_i32 = arith.constant 0 : i32
    %c0_i32_0 = arith.constant 0 : i32
    %c0_i32_1 = arith.constant 0 : i32
    %c0_i32_2 = arith.constant 0 : i32
    return %1, %c0_i32, %c0_i32_0, %c0_i32_1 : i32, i32, i32, i32
  }
  func.func @transform_1(%arg0: i32, %arg1: memref<8xi32, #tpu.memory_space<smem>>) -> (i32, i32, i32, i32) {
    %0 = arith.index_cast %arg0 : i32 to index
    %1 = memref.load %arg1[%0] : memref<8xi32, #tpu.memory_space<smem>>
    %c0_i32 = arith.constant 0 : i32
    %c0_i32_0 = arith.constant 0 : i32
    %c0_i32_1 = arith.constant 0 : i32
    %c0_i32_2 = arith.constant 0 : i32
    return %1, %c0_i32, %c0_i32_0, %c0_i32_1 : i32, i32, i32, i32
  }
  func.func @transform_2(%arg0: i32, %arg1: memref<8xi32, #tpu.memory_space<smem>>) -> (i32, i32, i32, i32) {
    %0 = arith.index_cast %arg0 : i32 to index
    %1 = memref.load %arg1[%0] : memref<8xi32, #tpu.memory_space<smem>>
    %c0_i32 = arith.constant 0 : i32
    %c0_i32_0 = arith.constant 0 : i32
    %c0_i32_1 = arith.constant 0 : i32
    %c0_i32_2 = arith.constant 0 : i32
    return %1, %c0_i32, %c0_i32_0, %c0_i32_1 : i32, i32, i32, i32
  }
  func.func @transform_3(%arg0: i32, %arg1: memref<8xi32, #tpu.memory_space<smem>>) -> (i32, i32, i32, i32) {
    %0 = arith.index_cast %arg0 : i32 to index
    %1 = memref.load %arg1[%0] : memref<8xi32, #tpu.memory_space<smem>>
    %c0_i32 = arith.constant 0 : i32
    %c0_i32_0 = arith.constant 0 : i32
    %c0_i32_1 = arith.constant 0 : i32
    %c0_i32_2 = arith.constant 0 : i32
    return %1, %c0_i32, %c0_i32_0, %c0_i32_1 : i32, i32, i32, i32
  }
  func.func @transform_4(%arg0: i32, %arg1: memref<8xi32, #tpu.memory_space<smem>>) -> (i32, i32, i32) {
    %c0_i32 = arith.constant 0 : i32
    %c0_i32_0 = arith.constant 0 : i32
    %c0_i32_1 = arith.constant 0 : i32
    return %arg0, %c0_i32, %c0_i32_0 : i32, i32, i32
  }
  func.func @transform_5(%arg0: i32, %arg1: memref<8xi32, #tpu.memory_space<smem>>) -> (i32, i32, i32) {
    %c0_i32 = arith.constant 0 : i32
    %c0_i32_0 = arith.constant 0 : i32
    %c0_i32_1 = arith.constant 0 : i32
    return %arg0, %c0_i32, %c0_i32_0 : i32, i32, i32
  }
  func.func @transform_6(%arg0: i32, %arg1: memref<8xi32, #tpu.memory_space<smem>>) -> (i32, i32, i32) {
    %c0_i32 = arith.constant 0 : i32
    %c0_i32_0 = arith.constant 0 : i32
    %c0_i32_1 = arith.constant 0 : i32
    return %arg0, %c0_i32, %c0_i32_0 : i32, i32, i32
  }
  func.func @transform_7(%arg0: i32, %arg1: memref<8xi32, #tpu.memory_space<smem>>) -> (i32, i32, i32) {
    %c0_i32 = arith.constant 0 : i32
    %c0_i32_0 = arith.constant 0 : i32
    %c0_i32_1 = arith.constant 0 : i32
    return %arg0, %c0_i32, %c0_i32_0 : i32, i32, i32
  }
  func.func @transform_8(%arg0: i32, %arg1: memref<8xi32, #tpu.memory_space<smem>>) -> (i32, i32, i32) {
    %c0_i32 = arith.constant 0 : i32
    %c0_i32_0 = arith.constant 0 : i32
    %c0_i32_1 = arith.constant 0 : i32
    return %arg0, %c0_i32, %c0_i32_0 : i32, i32, i32
  }
  func.func @transform_9(%arg0: i32, %arg1: memref<8xi32, #tpu.memory_space<smem>>) -> (i32, i32, i32) {
    %c0_i32 = arith.constant 0 : i32
    %c0_i32_0 = arith.constant 0 : i32
    %c0_i32_1 = arith.constant 0 : i32
    return %arg0, %c0_i32, %c0_i32_0 : i32, i32, i32
  }
  func.func @transform_10(%arg0: i32, %arg1: memref<8xi32, #tpu.memory_space<smem>>) -> (i32, i32, i32) {
    %c0_i32 = arith.constant 0 : i32
    %c0_i32_0 = arith.constant 0 : i32
    %c0_i32_1 = arith.constant 0 : i32
    return %arg0, %c0_i32, %c0_i32_0 : i32, i32, i32
  }
  func.func @transform_11(%arg0: i32, %arg1: memref<8xi32, #tpu.memory_space<smem>>) -> (i32, i32, i32) {
    %c0_i32 = arith.constant 0 : i32
    %c0_i32_0 = arith.constant 0 : i32
    %c0_i32_1 = arith.constant 0 : i32
    return %arg0, %c0_i32, %c0_i32_0 : i32, i32, i32
  }
  func.func @transform_12(%arg0: i32, %arg1: memref<8xi32, #tpu.memory_space<smem>>) -> (i32, i32, i32) {
    %c0_i32 = arith.constant 0 : i32
    %c0_i32_0 = arith.constant 0 : i32
    %c0_i32_1 = arith.constant 0 : i32
    %c0_i32_2 = arith.constant 0 : i32
    return %c0_i32, %c0_i32_0, %c0_i32_1 : i32, i32, i32
  }
  func.func @transform_13(%arg0: i32, %arg1: memref<8xi32, #tpu.memory_space<smem>>) -> (i32, i32) {
    %c0_i32 = arith.constant 0 : i32
    %c0_i32_0 = arith.constant 0 : i32
    %c0_i32_1 = arith.constant 0 : i32
    return %c0_i32, %c0_i32_0 : i32, i32
  }
  func.func @transform_14(%arg0: i32, %arg1: memref<8xi32, #tpu.memory_space<smem>>) -> (i32, i32, i32) {
    %c0_i32 = arith.constant 0 : i32
    %c0_i32_0 = arith.constant 0 : i32
    %c0_i32_1 = arith.constant 0 : i32
    %c0_i32_2 = arith.constant 0 : i32
    return %c0_i32, %c0_i32_0, %c0_i32_1 : i32, i32, i32
  }
  func.func @transform_15(%arg0: i32, %arg1: memref<8xi32, #tpu.memory_space<smem>>) -> (i32, i32) {
    %c0_i32 = arith.constant 0 : i32
    %c0_i32_0 = arith.constant 0 : i32
    %c0_i32_1 = arith.constant 0 : i32
    return %c0_i32, %c0_i32_0 : i32, i32
  }
  func.func @transform_16(%arg0: i32, %arg1: memref<8xi32, #tpu.memory_space<smem>>) -> (i32, i32) {
    %c0_i32 = arith.constant 0 : i32
    %c0_i32_0 = arith.constant 0 : i32
    %c0_i32_1 = arith.constant 0 : i32
    return %c0_i32, %c0_i32_0 : i32, i32
  }
  func.func @transform_17(%arg0: i32, %arg1: memref<8xi32, #tpu.memory_space<smem>>) -> (i32, i32, i32) {
    %c0_i32 = arith.constant 0 : i32
    %c0_i32_0 = arith.constant 0 : i32
    %c0_i32_1 = arith.constant 0 : i32
    return %arg0, %c0_i32, %c0_i32_0 : i32, i32, i32
  }
}

</mosaic_0001>

<bundles_post_ra>
// kernel: tpu_custom_call.1
= control target key start
LH: loop header
LB: loop body
LE: loop exit
PB: predicated region body
PF: predicated region fallthrough
CT: control target
= control target key end

     0   :  { %s5565_s27 = smov [#allocation3]   ;;  %s6314_s0 = inlined_call_operand.hbm [shape: s32[8], index: 0, kind: input, shape index: {}]   ;;  %s6315_s1 = inlined_call_operand.vmem [shape: f32[2,4,16,16], index: 1, kind: input, shape index: {}]   ;;  %s6316_s2 = inlined_call_operand.vmem [shape: f32[2,4,8,8], index: 2, kind: input, shape index: {}]   ;;  %s6317_s3 = inlined_call_operand.vmem [shape: f32[2,4,4,4], index: 3, kind: input, shape index: {}]   ;;  %s6318_s4 = inlined_call_operand.vmem [shape: f32[2,4,2,2], index: 4, kind: input, shape index: {}]   ;;  %s6319_s5 = inlined_call_operand.vmem [shape: f32[8,4,16], index: 5, kind: input, shape index: {}]   ;;  %s6320_s6 = inlined_call_operand.hbm [shape: f32[8,4,8], index: 6, kind: input, shape index: {}]   ;;  %s6321_s7 = inlined_call_operand.vmem [shape: f32[8,4,4], index: 7, kind: input, shape index: {}]   ;;  %s6322_s8 = inlined_call_operand.vmem [shape: f32[8,4,2], index: 8, kind: input, shape index: {}]   ;;  %s6323_s9 = inlined_call_operand.hbm [shape: f32[8,4,16], index: 9, kind: input, shape index: {}]   ;;  %s6324_s10 = inlined_call_operand.vmem [shape: f32[8,4,8], index: 10, kind: input, shape index: {}]   ;;  %s6325_s11 = inlined_call_operand.vmem [shape: f32[8,4,4], index: 11, kind: input, shape index: {}]   ;;  %s6326_s12 = inlined_call_operand.vmem [shape: f32[8,4,2], index: 12, kind: input, shape index: {}]   ;;  %s6327_s13 = inlined_call_operand.hbm [shape: f32[4,4,4], index: 13, kind: input, shape index: {}]   ;;  %s6328_s14 = inlined_call_operand.vmem [shape: f32[1,4], index: 14, kind: input, shape index: {}]   ;;  %s6329_s15 = inlined_call_operand.vmem [shape: f32[9,4,4], index: 15, kind: input, shape index: {}]   ;;  %s6330_s16 = inlined_call_operand.vmem [shape: f32[1,4], index: 16, kind: input, shape index: {}]   ;;  %s6331_s17 = inlined_call_operand.vmem [shape: f32[16,2], index: 17, kind: input, shape index: {}]   ;;  %s6332_s18 = inlined_call_operand.vmem [shape: f32[8,16,4], index: 18, kind: output, shape index: {}]  }
   0x1   :  { %6340 = sst [smem:[#allocation16_spill]] %s6314_s0 }
   0x2   :  { %6341 = sst [smem:[#allocation17_spill]] %s6315_s1 }
   0x3   :  { %6342 = sst [smem:[#allocation18_spill]] %s6316_s2 }
   0x4   :  { %6343 = sst [smem:[#allocation19_spill]] %s6326_s12 }
   0x5   :  { %6344 = sst [smem:[#allocation20_spill]] %s6327_s13 }
   0x6   :  { %6345 = sst [smem:[#allocation21_spill]] %s6328_s14 }
   0x7   :  { %6346 = sst [smem:[#allocation22_spill]] %s6329_s15 }
   0x8   :  { %6347 = sst [smem:[#allocation23_spill]] %s6330_s16 }
   0x9   :  { %6348 = sst [smem:[#allocation24_spill]] %s6332_s18 }
   0xa   :  { %s6349_s12 = sld [smem:[#allocation16_spill]] }
  0x10   :  { %24 = dma.hbm_to_smem %s6349_s12, 16, %s5565_s27, [#allocation2] }
  0x11   :  { %5535 = dma.done.wait [#allocation2], 16 }
  0x12   :  { %5536 = vsyncadd [#allocation2], 4294967280 }
  0x13   :  { %26 = sfence }
  0x14   :  { %27 = vsyncpa [#allocation5], 0 }
  0x15   :  { %29 = vsyncpa [#allocation5 + $0x1], 0 }
  0x16   :  { %30 = vsyncpa [#allocation7], 0 }
  0x17   :  { %32 = vsyncpa [#allocation7 + $0x1], 0  ;;  %s5675_s30 = smov 0   ;;  %s5677_s0 = smov 0  }
  0x18   :  { %s5679_s19 = smov 0   ;;  %s5681_s1 = smov 0  }
  0x19 LB: > { %6350 = sst [smem:[#allocation13_spill]] %s5559_s19  ;;  %s5694_s12 = sadd.s32 4294967295, %s5563_s1   ;;  %s5563_s1 = sphi %s5681_s1, %s6369_s1   ;;  %s5559_s19 = sphi %s5679_s19, %s6371_s19   ;;  %s5555_s0 = sphi %s5677_s0, %s6373_s0   ;;  %s5551_s30 = sphi %s5675_s30, %s6372_s30  }
  0x1a   : > { %p196_p0 = scmp.ne.s32.totalorder %s5555_s0, %s5551_s30  ;;  %p6337_p1 = scmp.eq.s32.totalorder %s5694_s12, 0 }
  0x1b   : > { %p4870_p2 = scmp.ge.s32.totalorder %s5563_s1, 1  ;;  %p494_p3 = scmp.lt.s32.totalorder %s5563_s1, 9 }
  0x1c   : > { %p5702_p4 = por %p6337_p1, %p196_p0  ;;  %s5566_s22 = smov [#allocation8]  }
  0x1d   : > { %p5706_p5 = pnand %p4870_p2, %p494_p3  ;;  %s506_s2 = sshll.u32 %s5566_s22, 4  ;;  %s507_s2 = int_to_ptr.vmem [resolvable:$true] %s506_s2 }
  0x1e   : > { %s6351_s20 = scalar_select %p5702_p4, 1, 0 }
  0x1f   : > { %s6352_s21 = scalar_select %p5706_p5, 1, 0 }
  0x20   : > { %p5357_p6 = pneg %p5706_p5  ;;  %s5719_s24 = sadd.s32 1, %s5563_s1  }
  0x21   : > { %6354 = sst [smem:[#allocation14_spill]] %s5719_s24  ;;  %s183_s25 = sadd.s32 1, %s5559_s19 }
  0x22   : > { %p5714_p7 = pnand %p5357_p6, %p6337_p1  ;;  %s180_s26 = ssub.s32 %s5563_s1, %s5719_s24 }
  0x23   : > { %s5448_s27 = scalar_lea.vmem %s507_s2, 256  ;;  %p5456_p12 = scmp.lt.s32.totalorder %s507_s2, %s507_s2 }
  0x24   : > { %p5439_p8 = pneg %p5714_p7  ;;  %p5449_p9 = scmp.ne.s32.totalorder %s507_s2, %s5448_s27 }
  0x25   : > { %p5457_p13 = scmp.lt.s32.totalorder %s5448_s27, %s5448_s27 }
  0x26   : > { %p5451_p10 = pnand %p5449_p9, %p5439_p8 }
  0x27   : > { %p5458_p0 = por %p5457_p13, %p5456_p12 }
  0x28   : > { %p5452_p11 = pneg %p5451_p10 }
  0x2a   : > { %p5459_p2 = pnand %p5458_p0, %p5452_p11 }
  0x2c   : > { %5462 = shalt.err (!%p5459_p2)
}
  0x2d   : > { %s5567_s28 = smov 64   ;;  %s5568_s29 = smov 4  }
  0x2e   : > { %s6355_s13 = sld [smem:[#allocation20_spill]]  ;;  %p181_p3 = scmp.eq.s32.totalorder %s180_s26, 0 }
  0x2f   : > { %p190_p6 = scmp.ne.s32.totalorder %s5559_s19, %s5555_s0  ;;  %p191_p8 = scmp.eq.s32.totalorder %s5563_s1, 0 }
  0x30   : > { %p5369_p9 = scmp.lt.s32.totalorder %s5563_s1, 8  ;;  %s579_s24 = sand.u32 1, %s5559_s19  }
  0x31   : > { %s5736_s27 = scalar_select %p181_p3, %s5559_s19, %s183_s25  }
  0x32   : > { %p192_p10 = por %p191_p8, %p190_p6  ;;  %s5739_s18 = sshll.u32 %s579_s24, 2 }
  0x33   : > { %6356 = sst [smem:[#allocation15_spill]] %s5736_s27  ;;  %s4874_s16 = sshll.u32 %s5563_s1, 6 }
  0x34   : > { %5360 = dma.hbm_to_vmem [thread:$0]  (!%p5714_p7), %s6355_s13, 256, %s507_s2, [#allocation7], %s5567_s28, %s5567_s28, %s5568_s29  }
  0x35   : > { %s5745_s23 = scalar_lea.hbm %s6320_s6, %s4874_s16  ;;  %s583_s2 = scalar_lea.vmem [#allocation4], %s5739_s18 }
  0x36   : > { %s590_s26 = sshll.u32 %s583_s2, 4  ;;  %p5750_p7 = pnand %p5369_p9, %p192_p10  ;;  %s5748_s26 = int_to_ptr.vmem [resolvable:$true] %s590_s26 }
  0x37   : > { %s5757_s30 = scalar_lea.hbm %s6323_s9, %s4874_s16  ;;  %s611_s14 = sand.u32 1, %s5563_s1  }
  0x38   : > { %s580_s15 = scalar_lea.sflag [#allocation5], %s579_s24  ;;  %s5463_s22 = scalar_lea.hbm %s5745_s23, 64 }
  0x39   : > { %p5464_p11 = scmp.ne.s32.totalorder %s5745_s23, %s5463_s22  ;;  %p5465_p12 = pneg %p5750_p7 }
  0x3a   : > { %s5468_s27 = scalar_lea.hbm %s6320_s6, 512  ;;  %p5469_p2 = scmp.lt.s32.totalorder %s5745_s23, %s6320_s6 }
  0x3b   : > { %p5466_p13 = pnand %p5465_p12, %p5464_p11  ;;  %p5470_p3 = scmp.lt.s32.totalorder %s5468_s27, %s5463_s22 }
  0x3d   : > { %p5467_p0 = pneg %p5466_p13  ;;  %p5471_p6 = por %p5470_p3, %p5469_p2 }
  0x3f   : > { %p5472_p8 = pnand %p5471_p6, %p5467_p0 }
  0x41   : > { %5475 = shalt.err (!%p5472_p8)
}
  0x42   : > { %s5476_s16 = scalar_lea.vmem %s5748_s26, 64  ;;  %s5569_s13 = smov [#allocation4]  }
  0x43   : > { %p5477_p9 = scmp.ne.s32.totalorder %s5748_s26, %s5476_s16  ;;  %s5481_s24 = sshll.u32 %s5569_s13, 4  ;;  %s5482_s24 = int_to_ptr.vmem [resolvable:$false] %s5481_s24 }
  0x44   : > { %s5483_s29 = scalar_lea.vmem %s5482_s24, 128  ;;  %p5484_p13 = scmp.lt.s32.totalorder %s5748_s26, %s5482_s24 }
  0x45   : > { %p5479_p10 = pnand %p5477_p9, %p5465_p12  ;;  %p5485_p1 = scmp.lt.s32.totalorder %s5483_s29, %s5476_s16 }
  0x47   : > { %p5480_p11 = pneg %p5479_p10  ;;  %p5486_p4 = por %p5485_p1, %p5484_p13 }
  0x49   : > { %p5487_p2 = pnand %p5486_p4, %p5480_p11 }
  0x4b   : > { %5490 = shalt.err (!%p5487_p2)
}
  0x4c   : > { %5364 = dma.hbm_to_vmem [thread:$0]  (!%p5750_p7), %s5745_s23, 64, %s5748_s26, %s580_s15  }
  0x4d   : > { %s615_s19 = scalar_lea.vmem [#allocation6], %s5739_s18  ;;  %s612_s22 = scalar_lea.sflag [#allocation7], %s611_s14 }
  0x4e   : > { %s622_s27 = sshll.u32 %s615_s19, 4  ;;  %s5491_s2 = scalar_lea.hbm %s5757_s30, 64  ;;  %s623_s27 = int_to_ptr.vmem [resolvable:$true] %s622_s27 }
  0x4f   : > { %p5492_p1 = scmp.ne.s32.totalorder %s5757_s30, %s5491_s2  ;;  %s5496_s13 = scalar_lea.hbm %s6323_s9, 512 }
  0x50   : > { %p5497_p3 = scmp.lt.s32.totalorder %s5757_s30, %s6323_s9  ;;  %p5498_p6 = scmp.lt.s32.totalorder %s5496_s13, %s5491_s2 }
  0x51   : > { %p5494_p4 = pnand %p5492_p1, %p5465_p12 }
  0x52   : > { %p5499_p8 = por %p5498_p6, %p5497_p3 }
  0x53   : > { %p5495_p0 = pneg %p5494_p4 }
  0x55   : > { %p5500_p9 = pnand %p5499_p8, %p5495_p0 }
  0x57   : > { %5503 = shalt.err (!%p5500_p9)
}
  0x58   : > { %s5504_s18 = scalar_lea.vmem %s623_s27, 64  ;;  %s5570_s1 = smov [#allocation6]  }
  0x59   : > { %p5505_p10 = scmp.ne.s32.totalorder %s623_s27, %s5504_s18  ;;  %s5509_s23 = sshll.u32 %s5570_s1, 4  ;;  %s5510_s23 = int_to_ptr.vmem [resolvable:$false] %s5509_s23 }
  0x5a   : > { %s5511_s26 = scalar_lea.vmem %s5510_s23, 128  ;;  %p5512_p2 = scmp.lt.s32.totalorder %s623_s27, %s5510_s23 }
  0x5b   : > { %p5507_p11 = pnand %p5505_p10, %p5465_p12  ;;  %p5513_p1 = scmp.lt.s32.totalorder %s5511_s26, %s5504_s18 }
  0x5d   : > { %p5508_p13 = pneg %p5507_p11  ;;  %p5514_p4 = por %p5513_p1, %p5512_p2 }
  0x5f   : > { %p5515_p5 = pnand %p5514_p4, %p5508_p13 }
  0x61   : > { %5518 = shalt.err (!%p5515_p5)
}
  0x62   : > { %5367 = dma.hbm_to_vmem [thread:$0]  (!%p5750_p7), %s5757_s30, 64, %s623_s27, %s612_s22  }
  0x63   : > { %p6358_p0 = scmp.ne.s32.totalorder %s6352_s21, 0 }
  0x64   : > { %s654_s14 = sand.u32 (!%p6358_p0), 1, %s5555_s0   ;;  %p6359_p12 = scmp.ne.s32.totalorder (!%p6358_p0), %s6351_s20, 0 }
  0x65   : > { %652 = sbr.rel (%p6358_p0) target bundleno = 1769 (0x6e9), region = 88  ;;  %s5808_s15 = sshll.u32 (!%p6358_p0), %s654_s14, 2 }
  0x66   : > { %s655_s19 = scalar_lea.sflag (!%p6358_p0), [#allocation5], %s654_s14  ;;  %s658_s2 = scalar_lea.vmem (!%p6358_p0), [#allocation4], %s5808_s15 }
  0x6a   : > { %5538 = dma.done.wait (%p6359_p12), %s655_s19, 64  }
  0x6b   : > { %5540 = vsyncadd (%p6359_p12), %s655_s19, 4294967232  ;;  %s663_s25 = sand.u32 1, %s5694_s12   ;;  %s667_s21 = scalar_lea.vmem [#allocation6], %s5808_s15 }
  0x6c   : > { %s664_s30 = scalar_lea.sflag [#allocation7], %s663_s25 }
  0x6d   : > { %5542 = dma.done.wait (%p6359_p12), %s664_s30, 64  }
  0x6e   : > { %5544 = vsyncadd (%p6359_p12), %s664_s30, 4294967232  ;;  %p6360_p5 = scmp.eq.s32.totalorder %s5694_s12, 0 }
  0x70   : > { %5546 = dma.done.wait (%p6360_p5), [#allocation7], 256   ;;  %p6361_p7 = pmov %p6360_p5 }
  0x71   : > { %p803_p3 = scmp.lt.s32.totalorder %s5694_s12, 7  ;;  %v5571_v0 = vmov 0.0   ;;  %s775_s27 = sld [smem:[#allocation3 + %s5694_s12]]  ;;  %vm5572_vm0 = vmmov 0   ;;  %vm842_vm1 = vcmask 130048   ;;  %vm1131_vm2 = vcmask 1041409  }
  0x72   : > { %5548 = vsyncadd (%p6361_p7), [#allocation7], 4294967040  ;;  %5116 = vmatprep.subr.mxu0 %v5571_v0  ;;  %5123 = vmatprep.subr.mxu1 %v5571_v0  ;;  %s6362_s1 = sld [smem:[#allocation17_spill]]  ;;  %vm1134_vm3 = vcmask 1042434   ;;  %vm1137_vm4 = vcmask 1043459   ;;  %vm1463_vm5 = vcmask 64512  }
  0x73   : > { %5120 = vmatprep.mubr.msk.f32.mxu0 %vm5572_vm0, %v5571_v0  ;;  %5127 = vmatprep.mubr.msk.f32.mxu1 %vm5572_vm0, %v5571_v0  ;;  %s5834_s20 = scalar_select %p803_p3, %s5694_s12, 7  ;;  %v841_v39 = vld [vmem:[%s667_s21] sm:$0xf]  ;;  %v1461_v45 = vld [vmem:[%s658_s2] sm:$0xf]  ;;  %vm1454_vm6 = vcmask 1043456  }
  0x74   : > { %s782_s26 = sld [smem:[#allocation3 + %s5694_s12]]  ;;  %vm2080_vm7 = vcmask 31744   ;;  %vm2713_vm8 = vcmask 1041408   ;;  %vm2709_vm9 = vcmask 15360   ;;  %vm3695_vm10 = vcmask 1044480  }
  0x75   : > { %s5837_s22 = sshll.u32 %s5834_s20, 2  ;;  %s6363_s30 = sld [smem:[#allocation18_spill]]  ;;  %vm3926_vm11 = vcmask 1045504   ;;  %vm3816_vm12 = vcmask 1046528   ;;  %vm4121_vm13 = vcmask 1042432  }
  0x76   : > { %s806_s24 = scalar_lea.vmem %s6319_s5, %s5837_s22  ;;  %s789_s15 = sld [smem:[#allocation3 + %s5694_s12]] }
  0x77   : > { %p776_p6 = scmp.lt.s32.totalorder %s775_s27, 1  ;;  %v840_v5 = vld [vmem:[%s806_s24] sm:$0xf]  ;;  %s822_s19 = scalar_lea.vmem %s6325_s11, %s5837_s22 }
  0x78   : > { %s6364_s24 = sld [smem:[#allocation19_spill]] }
  0x79   : > { %s6375_s27 = smov (!%p776_p6, %s775_s27), 1 }
  0x7a   : > { %s5004_s28 = sshll.u32 %s6375_s27, 6  ;;  %p783_p8 = scmp.lt.s32.totalorder %s782_s26, 1 }
  0x7b   : > { %s780_s23 = scalar_lea.vmem %s6362_s1, %s5004_s28  ;;  %s818_s28 = scalar_lea.vmem %s6324_s10, %s5837_s22 }
  0x7c   : > { %v833_v1 = vld [vmem:[%s780_s23 + $0x8] sm:$0xff]  ;;  %v835_v2 = vld [vmem:[%s780_s23 + $0x18] sm:$0xff]  ;;  %v832_v3 = vld [vmem:[%s780_s23] sm:$0xff]  ;;  %s6377_s26 = smov (!%p783_p8, %s782_s26), 1  ;;  %p790_p9 = scmp.lt.s32.totalorder %s789_s15, 1 }
  0x7d   : > { %5117 = vmatpush3.msra.mxu0 %v833_v1  ;;  %5124 = vmatpush3.msra.mxu1 %v835_v2  ;;  %v834_v4 = vld [vmem:[%s780_s23 + $0x10] sm:$0xff]  ;;  %v837_v6 = vld [vmem:[%s780_s23 + $0x28] sm:$0xff]  ;;  %v839_v7 = vld [vmem:[%s780_s23 + $0x38] sm:$0xff]  ;;  %s5005_s14 = sshll.u32 %s6377_s26, 5  ;;  %s796_s26 = sld [smem:[#allocation3 + %s5694_s12]] }
  0x7e   : > { %5118 = vmatprep.subr.mxu0 %v5571_v0  ;;  %5125 = vmatprep.subr.mxu1 %v5571_v0  ;;  %v836_v8 = vld [vmem:[%s780_s23 + $0x20] sm:$0xff]  ;;  %v838_v9 = vld [vmem:[%s780_s23 + $0x30] sm:$0xff]  ;;  %s787_s27 = scalar_lea.vmem %s6363_s30, %s5005_s14  ;;  %s6379_s15 = smov (!%p790_p9, %s789_s15), 1 }
  0x7f   : > { %5119 = vmatpush3.msra.mxu0 %v832_v3  ;;  %5126 = vmatpush3.msra.mxu1 %v834_v4  ;;  %v1457_v43 = vld [vmem:[%s787_s27] sm:$0xff]  ;;  %v1458_v44 = vld [vmem:[%s787_s27 + $0x8] sm:$0xff]  ;;  %v1459_v46 = vld [vmem:[%s787_s27 + $0x10] sm:$0xff]  ;;  %s5006_s16 = sshll.u32 %s6379_s15, 4  ;;  %s810_s23 = scalar_lea.vmem %s6321_s7, %s5837_s22 }
  0x80   : > { %5121 = vmatmul.mubr.msk.f32.vlgmr.msra.gmra.mxu0 %vm842_vm1, %v840_v5  ;;  %5128 = vmatmul.mubr.msk.f32.vlgmr.msra.gmra.mxu1 %vm842_vm1, %v840_v5  ;;  %v1460_v47 = vld [vmem:[%s787_s27 + $0x18] sm:$0xff]  ;;  %s794_s29 = scalar_lea.vmem %s6317_s3, %s5006_s16  ;;  %s6365_s14 = sld [smem:[#allocation22_spill]] }
  0x81   : > { %5130 = vmatprep.subr.mxu0 %v5571_v0  ;;  %5137 = vmatprep.subr.mxu1 %v5571_v0  ;;  %s6366_s16 = sld [smem:[#allocation21_spill]] }
  0x82   : > { %5131 = vmatpush3.msra.mxu0 %v837_v6  ;;  %5138 = vmatpush3.msra.mxu1 %v839_v7  ;;  %s6367_s27 = sld [smem:[#allocation23_spill]] }
  0x83   : > { %5132 = vmatprep.subr.mxu0 %v5571_v0  ;;  %5139 = vmatprep.subr.mxu1 %v5571_v0  ;;  %p797_p10 = scmp.lt.s32.totalorder %s796_s26, 1 }
  0x84   : > { %5133 = vmatpush3.msra.mxu0 %v836_v8  ;;  %5134 = vmatprep.mubr.msk.f32.mxu0 %vm5572_vm0, %v5571_v0 }
  0x85   : > { %5140 = vmatpush3.msra.mxu1 %v838_v9  ;;  %5141 = vmatprep.mubr.msk.f32.mxu1 %vm5572_vm0, %v5571_v0  ;;  %s6381_s26 = smov (!%p797_p10, %s796_s26), 1 }
  0x86   : > { %5135 = vmatmul.mubr.msk.f32.vlgmr.msra.gmra.mxu0 %vm842_vm1, %v840_v5  ;;  %5142 = vmatmul.mubr.msk.f32.vlgmr.msra.gmra.mxu1 %vm842_vm1, %v840_v5  ;;  %s5007_s25 = sshll.u32 %s6381_s26, 3 }
  0x87   : > { %5144 = vmatprep.subr.mxu0 %v5571_v0  ;;  %5149 = vmatprep.subr.mxu1 %v5571_v0  ;;  %s801_s15 = scalar_lea.vmem %s6318_s4, %s5007_s25 }
  0x88   : > { %5146 = vmatprep.mubr.msk.f32.mxu0 %vm5572_vm0, %v5571_v0  ;;  %5151 = vmatprep.mubr.msk.f32.mxu1 %vm5572_vm0, %v5571_v0 }
 0x140   : > { %v912_v10 = vpop.f32.mrf.mxu0  ;;  %v982_v11 = vpop.f32.mrf.mxu1 }
 0x141   : > { %v1214_v14 = vrot.slane %v912_v10, 1  ;;  %v1292_v15 = vrot.slane %v912_v10, 2  ;;  %v1130_v16 = vrot.slane %v982_v11, 7  ;;  %v1293_v17 = vrot.slane %v982_v11, 1 }
 0x142   : > { %v5122_v12 = vpop.f32.mrf.mxu0  ;;  %v5129_v13 = vpop.f32.mrf.mxu1  ;;  %v1370_v18 = vrot.slane %v912_v10, 3  ;;  %v1371_v19 = vrot.slane %v982_v11, 2 }
 0x143   : > { %v1215_v22 = vsel %vm1131_vm2, %v982_v11, %v1214_v14  ;;  %v1294_v26 = vsel %vm1131_vm2, %v1293_v17, %v1292_v15  ;;  %v1132_v31 = vsel %vm1131_vm2, %v1130_v16, %v912_v10 }
 0x144   : > { %v1372_v37 = vsel %vm1131_vm2, %v1371_v19, %v1370_v18 }
 0x146   : > { %v1052_v20 = vpop.f32.mrf.mxu0  ;;  %v1122_v21 = vpop.f32.mrf.mxu1 }
 0x147   : > { %v1133_v23 = vrot.slane %v1052_v20, 6  ;;  %v1216_v24 = vrot.slane %v1052_v20, 7  ;;  %v1373_v25 = vrot.slane %v1052_v20, 1  ;;  %v1136_v27 = vrot.slane %v1122_v21, 5 }
 0x148   : > { %v1218_v28 = vrot.slane %v1122_v21, 6  ;;  %v5136_v29 = vpop.f32.mrf.mxu0  ;;  %v5143_v30 = vpop.f32.mrf.mxu1  ;;  %v1296_v34 = vrot.slane %v1122_v21, 7  ;;  %v1295_v38 = vsel %vm1134_vm3, %v1052_v20, %v1294_v26  ;;  %v1462_v26 = vld [vmem:[%s818_s28] sm:$0xf]  ;;  %s814_s28 = scalar_lea.vmem %s6322_s8, %s5837_s22 }
 0x149   : > { %v1135_v32 = vsel %vm1134_vm3, %v1133_v23, %v1132_v31  ;;  %v1217_v33 = vsel %vm1134_vm3, %v1216_v24, %v1215_v22  ;;  %v1374_v40 = vsel %vm1134_vm3, %v1373_v25, %v1372_v37  ;;  %v2074_v30 = vld [vmem:[%s794_s29] sm:$0xf]  ;;  %v2075_v31 = vld [vmem:[%s794_s29 + $0x4] sm:$0xf] }
 0x14a   : > { %v1138_v35 = vsel %vm1137_vm4, %v1136_v27, %v1135_v32  ;;  %v1219_v36 = vsel %vm1137_vm4, %v1218_v28, %v1217_v33  ;;  %v1297_v41 = vsel %vm1137_vm4, %v1296_v34, %v1295_v38  ;;  %v1375_v42 = vsel %vm1137_vm4, %v1122_v21, %v1374_v40  ;;  %v2078_v32 = vld [vmem:[%s810_s23] sm:$0xf]  ;;  %v2076_v33 = vld [vmem:[%s794_s29 + $0x8] sm:$0xf]  ;;  %v2077_v34 = vld [vmem:[%s794_s29 + $0xc] sm:$0xf]  ;;  %s826_s29 = scalar_lea.vmem %s6364_s24, %s5837_s22 }
 0x14b   : > { %5145 = vmatpush3.xpose.msk.msra.mxu0 %vm842_vm1, %v1138_v35  ;;  %5150 = vmatpush3.xpose.msk.msra.mxu1 %vm842_vm1, %v1219_v36 }
 0x14c   : > { %5154 = vmatprep.subr.mxu0 %v5571_v0  ;;  %5159 = vmatprep.subr.mxu1 %v5571_v0 }
 0x14e   : > { %5147 = vmatmul.mubr.msk.f32.vlgmr.msra.gmra.mxu0 %vm842_vm1, %v841_v39  ;;  %5152 = vmatmul.mubr.msk.f32.vlgmr.msra.gmra.mxu1 %vm842_vm1, %v841_v39 }
 0x14f   : > { %5155 = vmatpush3.xpose.msk.msra.mxu0 %vm842_vm1, %v1297_v41  ;;  %5160 = vmatpush3.xpose.msk.msra.mxu1 %vm842_vm1, %v1375_v42 }
 0x150   : > { %5156 = vmatprep.mubr.msk.f32.mxu0 %vm5572_vm0, %v5571_v0  ;;  %5161 = vmatprep.mubr.msk.f32.mxu1 %vm5572_vm0, %v5571_v0 }
 0x151   : > { %5164 = vmatprep.subr.mxu0 %v5571_v0  ;;  %5169 = vmatprep.subr.mxu1 %v5571_v0 }
 0x152   : > { %5157 = vmatmul.mubr.msk.f32.vlgmr.msra.gmra.mxu0 %vm842_vm1, %v841_v39  ;;  %5162 = vmatmul.mubr.msk.f32.vlgmr.msra.gmra.mxu1 %vm842_vm1, %v841_v39 }
 0x153   : > { %5165 = vmatpush3.msra.mxu0 %v1457_v43  ;;  %5170 = vmatpush3.msra.mxu1 %v1458_v44 }
 0x154   : > { %5166 = vmatprep.mubr.msk.f32.mxu0 %vm5572_vm0, %v5571_v0  ;;  %5171 = vmatprep.mubr.msk.f32.mxu1 %vm5572_vm0, %v5571_v0 }
 0x155   : > { %5174 = vmatprep.subr.mxu0 %v5571_v0  ;;  %5179 = vmatprep.subr.mxu1 %v5571_v0 }
 0x156   : > { %5167 = vmatmul.mubr.msk.f32.vlgmr.msra.gmra.mxu0 %vm1463_vm5, %v1461_v45  ;;  %5172 = vmatmul.mubr.msk.f32.vlgmr.msra.gmra.mxu1 %vm1463_vm5, %v1461_v45 }
 0x157   : > { %5175 = vmatpush3.msra.mxu0 %v1459_v46  ;;  %5180 = vmatpush3.msra.mxu1 %v1460_v47 }
 0x158   : > { %5176 = vmatprep.mubr.msk.f32.mxu0 %vm5572_vm0, %v5571_v0  ;;  %5181 = vmatprep.mubr.msk.f32.mxu1 %vm5572_vm0, %v5571_v0 }
 0x159   : > { %5184 = vmatprep.subr.mxu0 %v5571_v0  ;;  %5189 = vmatprep.subr.mxu1 %v5571_v0 }
 0x15a   : > { %5177 = vmatmul.mubr.msk.f32.vlgmr.msra.gmra.mxu0 %vm1463_vm5, %v1461_v45  ;;  %5182 = vmatmul.mubr.msk.f32.vlgmr.msra.gmra.mxu1 %vm1463_vm5, %v1461_v45 }
 0x15b   : > { %5186 = vmatprep.mubr.msk.f32.mxu0 %vm5572_vm0, %v5571_v0  ;;  %5191 = vmatprep.mubr.msk.f32.mxu1 %vm5572_vm0, %v5571_v0 }
 0x20e   : > { %v1210_v48 = vpop.f32.mrf.mxu0  ;;  %v1288_v49 = vpop.f32.mrf.mxu1 }
 0x20f   : > { %v1449_v50 = vrot.slane %v1288_v49, 4 }
 0x210   : > { %v5148_v51 = vpop.f32.mrf.mxu0  ;;  %v5153_v52 = vpop.f32.mrf.mxu1 }
 0x211   : > { %v5924_v53 = vsel %vm1454_vm6, %v1210_v48, %v1449_v50 }
 0x212   : > { %v1366_v54 = vpop.f32.mrf.mxu0  ;;  %v1444_v55 = vpop.f32.mrf.mxu1 }
 0x213   : > { %v1452_v56 = vrot.slane %v1444_v55, 4 }
 0x214   : > { %v5158_v57 = vpop.f32.mrf.mxu0  ;;  %v5163_v58 = vpop.f32.mrf.mxu1 }
 0x215   : > { %v5927_v59 = vsel %vm1454_vm6, %v1366_v54, %v1452_v56 }
 0x216   : > { %v1533_v60 = vpop.f32.mrf.mxu0  ;;  %v1603_v61 = vpop.f32.mrf.mxu1 }
 0x217   : > { %v1832_v62 = vrot.slane %v1533_v60, 1  ;;  %v1910_v63 = vrot.slane %v1533_v60, 2  ;;  %v1751_v1 = vrot.slane %v1603_v61, 7  ;;  %v1911_v2 = vrot.slane %v1603_v61, 1 }
 0x218   : > { %v5168_v3 = vpop.f32.mrf.mxu0  ;;  %v5173_v4 = vpop.f32.mrf.mxu1  ;;  %v1988_v5 = vrot.slane %v1533_v60, 3  ;;  %v1989_v6 = vrot.slane %v1603_v61, 2 }
 0x219   : > { %v1833_v9 = vsel %vm1131_vm2, %v1603_v61, %v1832_v62  ;;  %v1912_v13 = vsel %vm1131_vm2, %v1911_v2, %v1910_v63  ;;  %v1752_v18 = vsel %vm1131_vm2, %v1751_v1, %v1533_v60 }
 0x21a   : > { %v1673_v7 = vpop.f32.mrf.mxu0  ;;  %v1743_v8 = vpop.f32.mrf.mxu1  ;;  %v1990_v24 = vsel %vm1131_vm2, %v1989_v6, %v1988_v5 }
 0x21b   : > { %v1753_v10 = vrot.slane %v1673_v7, 6  ;;  %v1834_v11 = vrot.slane %v1673_v7, 7  ;;  %v1991_v12 = vrot.slane %v1673_v7, 1  ;;  %v1755_v14 = vrot.slane %v1743_v8, 5 }
 0x21c   : > { %v1836_v15 = vrot.slane %v1743_v8, 6  ;;  %v5178_v16 = vpop.f32.mrf.mxu0  ;;  %v5183_v17 = vpop.f32.mrf.mxu1  ;;  %v1914_v21 = vrot.slane %v1743_v8, 7  ;;  %v1913_v25 = vsel %vm1134_vm3, %v1673_v7, %v1912_v13 }
 0x21d   : > { %v1754_v19 = vsel %vm1134_vm3, %v1753_v10, %v1752_v18  ;;  %v1835_v20 = vsel %vm1134_vm3, %v1834_v11, %v1833_v9  ;;  %v1992_v27 = vsel %vm1134_vm3, %v1991_v12, %v1990_v24 }
 0x21e   : > { %v1756_v22 = vsel %vm1137_vm4, %v1755_v14, %v1754_v19  ;;  %v1837_v23 = vsel %vm1137_vm4, %v1836_v15, %v1835_v20  ;;  %v1915_v28 = vsel %vm1137_vm4, %v1914_v21, %v1913_v25  ;;  %v1993_v29 = vsel %vm1137_vm4, %v1743_v8, %v1992_v27  ;;  %v2079_v15 = vld [vmem:[%s822_s19] sm:$0xf] }
 0x21f   : > { %5185 = vmatpush3.xpose.msk.msra.mxu0 %vm1463_vm5, %v1756_v22  ;;  %5190 = vmatpush3.xpose.msk.msra.mxu1 %vm1463_vm5, %v1837_v23  ;;  %v2703_v19 = vld [vmem:[%s801_s15] sm:$0x3]  ;;  %v2704_v20 = vld [vmem:[%s801_s15 + $0x2] sm:$0x3]  ;;  %v2705_v22 = vld [vmem:[%s801_s15 + $0x4] sm:$0x3] }
 0x220   : > { %5194 = vmatprep.subr.mxu0 %v5571_v0  ;;  %5199 = vmatprep.subr.mxu1 %v5571_v0  ;;  %v2707_v21 = vld [vmem:[%s814_s28] sm:$0xf]  ;;  %v2706_v23 = vld [vmem:[%s801_s15 + $0x6] sm:$0x3]  ;;  %s5008_s15 = sshll.u32 %s5834_s20, 4  ;;  %s6368_s28 = sld [smem:[#allocation24_spill]] }
 0x222   : > { %5187 = vmatmul.mubr.msk.f32.vlgmr.msra.gmra.mxu0 %vm1463_vm5, %v1462_v26  ;;  %5192 = vmatmul.mubr.msk.f32.vlgmr.msra.gmra.mxu1 %vm1463_vm5, %v1462_v26 }
 0x223   : > { %5195 = vmatpush3.xpose.msk.msra.mxu0 %vm1463_vm5, %v1915_v28  ;;  %5200 = vmatpush3.xpose.msk.msra.mxu1 %vm1463_vm5, %v1993_v29 }
 0x224   : > { %5196 = vmatprep.mubr.msk.f32.mxu0 %vm5572_vm0, %v5571_v0  ;;  %5201 = vmatprep.mubr.msk.f32.mxu1 %vm5572_vm0, %v5571_v0 }
 0x225   : > { %5204 = vmatprep.subr.mxu0 %v5571_v0  ;;  %5209 = vmatprep.subr.mxu1 %v5571_v0 }
 0x226   : > { %5197 = vmatmul.mubr.msk.f32.vlgmr.msra.gmra.mxu0 %vm1463_vm5, %v1462_v26  ;;  %5202 = vmatmul.mubr.msk.f32.vlgmr.msra.gmra.mxu1 %vm1463_vm5, %v1462_v26 }
 0x227   : > { %5205 = vmatpush3.msk.msra.mxu0 %vm1454_vm6, %v2074_v30  ;;  %5210 = vmatpush3.msk.msra.mxu1 %vm1454_vm6, %v2075_v31 }
 0x228   : > { %5206 = vmatprep.mubr.msk.f32.mxu0 %vm5572_vm0, %v5571_v0  ;;  %5211 = vmatprep.mubr.msk.f32.mxu1 %vm5572_vm0, %v5571_v0 }
 0x229   : > { %5214 = vmatprep.subr.mxu0 %v5571_v0  ;;  %5219 = vmatprep.subr.mxu1 %v5571_v0 }
 0x22a   : > { %5207 = vmatmul.mubr.msk.f32.vlgmr.msra.gmra.mxu0 %vm2080_vm7, %v2078_v32  ;;  %5212 = vmatmul.mubr.msk.f32.vlgmr.msra.gmra.mxu1 %vm2080_vm7, %v2078_v32 }
 0x22b   : > { %5215 = vmatpush3.msk.msra.mxu0 %vm1454_vm6, %v2076_v33  ;;  %5220 = vmatpush3.msk.msra.mxu1 %vm1454_vm6, %v2077_v34 }
 0x22c   : > { %5216 = vmatprep.mubr.msk.f32.mxu0 %vm5572_vm0, %v5571_v0  ;;  %5221 = vmatprep.mubr.msk.f32.mxu1 %vm5572_vm0, %v5571_v0 }
 0x22d   : > { %5224 = vmatprep.subr.mxu0 %v5571_v0  ;;  %5229 = vmatprep.subr.mxu1 %v5571_v0 }
 0x22e   : > { %5217 = vmatmul.mubr.msk.f32.vlgmr.msra.gmra.mxu0 %vm2080_vm7, %v2078_v32  ;;  %5222 = vmatmul.mubr.msk.f32.vlgmr.msra.gmra.mxu1 %vm2080_vm7, %v2078_v32 }
 0x22f   : > { %5226 = vmatprep.mubr.msk.f32.mxu0 %vm5572_vm0, %v5571_v0  ;;  %5231 = vmatprep.mubr.msk.f32.mxu1 %vm5572_vm0, %v5571_v0 }
 0x2e2   : > { %v1828_v35 = vpop.f32.mrf.mxu0  ;;  %v1906_v36 = vpop.f32.mrf.mxu1 }
 0x2e3   : > { %v2067_v37 = vrot.slane %v1906_v36, 4 }
 0x2e4   : > { %v5188_v38 = vpop.f32.mrf.mxu0  ;;  %v5193_v39 = vpop.f32.mrf.mxu1 }
 0x2e5   : > { %v5994_v40 = vsel %vm1454_vm6, %v1828_v35, %v2067_v37 }
 0x2e6   : > { %v1984_v41 = vpop.f32.mrf.mxu0  ;;  %v2062_v42 = vpop.f32.mrf.mxu1 }
 0x2e7   : > { %v2070_v43 = vrot.slane %v2062_v42, 4 }
 0x2e8   : > { %v5198_v44 = vpop.f32.mrf.mxu0  ;;  %v5203_v45 = vpop.f32.mrf.mxu1 }
 0x2e9   : > { %v5997_v46 = vsel %vm1454_vm6, %v1984_v41, %v2070_v43 }
 0x2ea   : > { %v2153_v47 = vpop.f32.mrf.mxu0  ;;  %v2226_v48 = vpop.f32.mrf.mxu1 }
 0x2eb   : > { %v2461_v49 = vrot.slane %v2153_v47, 1  ;;  %v2539_v50 = vrot.slane %v2153_v47, 2  ;;  %v2380_v51 = vrot.slane %v2226_v48, 7  ;;  %v2540_v52 = vrot.slane %v2226_v48, 1 }
 0x2ec   : > { %v5208_v54 = vpop.f32.mrf.mxu0  ;;  %v5213_v55 = vpop.f32.mrf.mxu1  ;;  %v2617_v56 = vrot.slane %v2153_v47, 3  ;;  %v2618_v57 = vrot.slane %v2226_v48, 2 }
 0x2ed   : > { %v2462_v61 = vsel %vm1131_vm2, %v2226_v48, %v2461_v49  ;;  %v2541_v2 = vsel %vm1131_vm2, %v2540_v52, %v2539_v50  ;;  %v2381_v7 = vsel %vm1131_vm2, %v2380_v51, %v2153_v47 }
 0x2ee   : > { %v2299_v58 = vpop.f32.mrf.mxu0  ;;  %v2372_v60 = vpop.f32.mrf.mxu1  ;;  %v2619_v13 = vsel %vm1131_vm2, %v2618_v57, %v2617_v56 }
 0x2ef   : > { %v2382_v62 = vrot.slane %v2299_v58, 6  ;;  %v2463_v63 = vrot.slane %v2299_v58, 7  ;;  %v2620_v1 = vrot.slane %v2299_v58, 1  ;;  %v2384_v3 = vrot.slane %v2372_v60, 5 }
 0x2f0   : > { %v2465_v4 = vrot.slane %v2372_v60, 6  ;;  %v5218_v5 = vpop.f32.mrf.mxu0  ;;  %v5223_v6 = vpop.f32.mrf.mxu1  ;;  %v2543_v10 = vrot.slane %v2372_v60, 7  ;;  %v2542_v14 = vsel %vm1134_vm3, %v2299_v58, %v2541_v2  ;;  %v2708_v2 = vld [vmem:[%s826_s29] sm:$0xf] }
 0x2f1   : > { %v2383_v8 = vsel %vm1134_vm3, %v2382_v62, %v2381_v7  ;;  %v2464_v9 = vsel %vm1134_vm3, %v2463_v63, %v2462_v61  ;;  %v2621_v16 = vsel %vm1134_vm3, %v2620_v1, %v2619_v13  ;;  %v3334_v6 = vld [vmem:[#allocation8] sm:$0xf]  ;;  %v3428_v7 = vld [vmem:[#allocation8 + $0x4] sm:$0xf]  ;;  %v3604_v13 = vld [vmem:[#allocation8 + $0xc] sm:$0xf] }
 0x2f2   : > { %v2385_v11 = vsel %vm1137_vm4, %v2384_v3, %v2383_v8  ;;  %v2466_v12 = vsel %vm1137_vm4, %v2465_v4, %v2464_v9  ;;  %v2544_v17 = vsel %vm1137_vm4, %v2543_v10, %v2542_v14  ;;  %v2622_v18 = vsel %vm1137_vm4, %v2372_v60, %v2621_v16  ;;  %v3516_v9 = vld [vmem:[#allocation8 + $0x8] sm:$0xf]  ;;  %v3705_v14 = vld [vmem:[%s6331_s17] sm:$0xff] }
 0x2f3   : > { %5225 = vmatpush3.xpose.msk.msra.mxu0 %vm2080_vm7, %v2385_v11  ;;  %5230 = vmatpush3.xpose.msk.msra.mxu1 %vm2080_vm7, %v2466_v12  ;;  %v5574_v16 = vmov 0  }
 0x2f4   : > { %5234 = vmatprep.subr.mxu0 %v5571_v0  ;;  %5239 = vmatprep.subr.mxu1 %v5571_v0 }
 0x2f5   : > { %5414 = vset.pattern.permute.xlu1 %v5574_v16 }
 0x2f6   : > { %5227 = vmatmul.mubr.msk.f32.vlgmr.msra.gmra.mxu0 %vm2080_vm7, %v2079_v15  ;;  %5232 = vmatmul.mubr.msk.f32.vlgmr.msra.gmra.mxu1 %vm2080_vm7, %v2079_v15 }
 0x2f7   : > { %5235 = vmatpush3.xpose.msk.msra.mxu0 %vm2080_vm7, %v2544_v17  ;;  %5240 = vmatpush3.xpose.msk.msra.mxu1 %vm2080_vm7, %v2622_v18  ;;  %v3706_v17 = vld [vmem:[%s6331_s17 + $0x8] sm:$0xff] }
 0x2f8   : > { %5236 = vmatprep.mubr.msk.f32.mxu0 %vm5572_vm0, %v5571_v0  ;;  %5241 = vmatprep.mubr.msk.f32.mxu1 %vm5572_vm0, %v5571_v0 }
 0x2f9   : > { %5244 = vmatprep.subr.mxu0 %v5571_v0  ;;  %5249 = vmatprep.subr.mxu1 %v5571_v0 }
 0x2fa   : > { %5237 = vmatmul.mubr.msk.f32.vlgmr.msra.gmra.mxu0 %vm2080_vm7, %v2079_v15  ;;  %5242 = vmatmul.mubr.msk.f32.vlgmr.msra.gmra.mxu1 %vm2080_vm7, %v2079_v15  ;;  %v5573_v15 = vmov 1  }
 0x2fb   : > { %5245 = vmatpush3.msk.msra.mxu0 %vm2713_vm8, %v2703_v19  ;;  %5250 = vmatpush3.msk.msra.mxu1 %vm2713_vm8, %v2704_v20 }
 0x2fc   : > { %5246 = vmatprep.mubr.msk.f32.mxu0 %vm5572_vm0, %v5571_v0  ;;  %5251 = vmatprep.mubr.msk.f32.mxu1 %vm5572_vm0, %v5571_v0 }
 0x2fd   : > { %5254 = vmatprep.subr.mxu0 %v5571_v0  ;;  %5259 = vmatprep.subr.mxu1 %v5571_v0 }
 0x2fe   : > { %5247 = vmatmul.mubr.msk.f32.vlgmr.msra.gmra.mxu0 %vm2709_vm9, %v2707_v21  ;;  %5252 = vmatmul.mubr.msk.f32.vlgmr.msra.gmra.mxu1 %vm2709_vm9, %v2707_v21 }
 0x2ff   : > { %5255 = vmatpush3.msk.msra.mxu0 %vm2713_vm8, %v2705_v22  ;;  %5260 = vmatpush3.msk.msra.mxu1 %vm2713_vm8, %v2706_v23 }
 0x300   : > { %5256 = vmatprep.mubr.msk.f32.mxu0 %vm5572_vm0, %v5571_v0  ;;  %5261 = vmatprep.mubr.msk.f32.mxu1 %vm5572_vm0, %v5571_v0 }
 0x301   : > { %5264 = vmatprep.subr.mxu0 %v5571_v0  ;;  %5269 = vmatprep.subr.mxu1 %v5571_v0 }
 0x302   : > { %5257 = vmatmul.mubr.msk.f32.vlgmr.msra.gmra.mxu0 %vm2709_vm9, %v2707_v21  ;;  %5262 = vmatmul.mubr.msk.f32.vlgmr.msra.gmra.mxu1 %vm2709_vm9, %v2707_v21 }
 0x303   : > { %5266 = vmatprep.mubr.msk.f32.mxu0 %vm5572_vm0, %v5571_v0  ;;  %5271 = vmatprep.mubr.msk.f32.mxu1 %vm5572_vm0, %v5571_v0 }
 0x304   : > { %5413 = vset.pattern.permute.xlu0 %v5573_v15  ;;  %3709 = vperm.xlu1 %5414, %v3705_v14  }
 0x305   : > { %3907 = vperm.xlu0 %5413, %v3705_v14  }
 0x308   : > { %3714 = vperm.xlu1 %5414, %v3706_v17  }
 0x309   : > { %3910 = vperm.xlu0 %5413, %v3706_v17  }
 0x3b6   : > { %v6062_v24 = vpop.f32.mrf.mxu0  ;;  %v6064_v25 = vpop.f32.mrf.mxu1 }
 0x3b7   : > { %v2696_v8 = vrot.slane %v6064_v25, 4 }
 0x3b8   : > { %v5228_v26 = vpop.f32.mrf.mxu0  ;;  %v5233_v27 = vpop.f32.mrf.mxu1 }
 0x3b9   : > { %v6117_v11 = vsel %vm1454_vm6, %v6062_v24, %v2696_v8 }
 0x3ba   : > { %v6066_v28 = vpop.f32.mrf.mxu0  ;;  %v6068_v29 = vpop.f32.mrf.mxu1 }
 0x3bb   : > { %v2699_v10 = vrot.slane %v6068_v29, 4 }
 0x3bc   : > { %v5238_v30 = vpop.f32.mrf.mxu0  ;;  %v5243_v31 = vpop.f32.mrf.mxu1 }
 0x3bd   : > { %v6124_v12 = vsel %vm1454_vm6, %v6066_v28, %v2699_v10  ;;  %v3719_v30 = vld [vmem:[%s6365_s14] sm:$0xf]  ;;  %v4970_v31 = vld [vmem:[%s6365_s14 + $0x4] sm:$0xf] }
 0x3be   : > { %v2783_v32 = vpop.f32.mrf.mxu0  ;;  %v2856_v33 = vpop.f32.mrf.mxu1 }
 0x3bf   : > { %v3091_v34 = vrot.slane %v2783_v32, 1  ;;  %v3169_v35 = vrot.slane %v2783_v32, 2  ;;  %v3010_v36 = vrot.slane %v2856_v33, 7  ;;  %v3170_v37 = vrot.slane %v2856_v33, 1 }
 0x3c0   : > { %v5248_v38 = vpop.f32.mrf.mxu0  ;;  %v5253_v39 = vpop.f32.mrf.mxu1  ;;  %v3247_v41 = vrot.slane %v2783_v32, 3  ;;  %v3248_v42 = vrot.slane %v2856_v33, 2 }
 0x3c1   : > { %v3092_v45 = vsel %vm1131_vm2, %v2856_v33, %v3091_v34  ;;  %v3171_v50 = vsel %vm1131_vm2, %v3170_v37, %v3169_v35  ;;  %v3011_v56 = vsel %vm1131_vm2, %v3010_v36, %v2783_v32  ;;  %v6161_v32 = vld [vmem:[%s6365_s14 + $0x8] sm:$0xf]  ;;  %v6168_v33 = vld [vmem:[%s6365_s14 + $0xc] sm:$0xf]  ;;  %v4956_v35 = vld [vmem:[%s6366_s16] ss:$0 sm:$0xff]  ;;  %s831_s16 = scalar_lea.vmem %s6368_s28, %s5008_s15 }
 0x3c2   : > { %v2929_v43 = vpop.f32.mrf.mxu0  ;;  %v3002_v44 = vpop.f32.mrf.mxu1  ;;  %v3249_v63 = vsel %vm1131_vm2, %v3248_v42, %v3247_v41 }
 0x3c3   : > { %v3012_v47 = vrot.slane %v2929_v43, 6  ;;  %v3093_v48 = vrot.slane %v2929_v43, 7  ;;  %v3250_v49 = vrot.slane %v2929_v43, 1  ;;  %v3014_v51 = vrot.slane %v3002_v44, 5 }
 0x3c4   : > { %v3095_v52 = vrot.slane %v3002_v44, 6  ;;  %v5258_v54 = vpop.f32.mrf.mxu0  ;;  %v5263_v55 = vpop.f32.mrf.mxu1  ;;  %v3173_v60 = vrot.slane %v3002_v44, 7  ;;  %v3172_v1 = vsel %vm1134_vm3, %v2929_v43, %v3171_v50 }
 0x3c5   : > { %v3013_v57 = vsel %vm1134_vm3, %v3012_v47, %v3011_v56  ;;  %v3094_v58 = vsel %vm1134_vm3, %v3093_v48, %v3092_v45  ;;  %v3251_v3 = vsel %vm1134_vm3, %v3250_v49, %v3249_v63  ;;  %v6175_v47 = vpop.permute.xlu1 %3709 }
 0x3c6   : > { %v3015_v61 = vsel %vm1137_vm4, %v3014_v51, %v3013_v57  ;;  %v3096_v62 = vsel %vm1137_vm4, %v3095_v52, %v3094_v58  ;;  %v3174_v4 = vsel %vm1137_vm4, %v3173_v60, %v3172_v1  ;;  %v3252_v5 = vsel %vm1137_vm4, %v3002_v44, %v3251_v3  ;;  %v3908_v44 = vpop.permute.xlu0 %3907 }
 0x3c7   : > { %5265 = vmatpush3.xpose.msk.msra.mxu0 %vm2709_vm9, %v3015_v61  ;;  %5270 = vmatpush3.xpose.msk.msra.mxu1 %vm2709_vm9, %v3096_v62  ;;  %v6179_v60 = vrot.slane %v3908_v44, 6  ;;  %v4211_v1 = vrot.slane %v3908_v44, 2 }
 0x3c8   : > { %5274 = vmatprep.subr.mxu0 %v5571_v0  ;;  %5279 = vmatprep.subr.mxu1 %v5571_v0 }
 0x3c9   : > { %v6177_v58 = vpop.permute.xlu1 %3714 }
 0x3ca   : > { %5267 = vmatmul.mubr.msk.f32.vlgmr.msra.gmra.mxu0 %vm2709_vm9, %v2708_v2  ;;  %5272 = vmatmul.mubr.msk.f32.vlgmr.msra.gmra.mxu1 %vm2709_vm9, %v2708_v2  ;;  %v3911_v55 = vpop.permute.xlu0 %3910 }
 0x3cb   : > { %5275 = vmatpush3.xpose.msk.msra.mxu0 %vm2709_vm9, %v3174_v4  ;;  %5280 = vmatpush3.xpose.msk.msra.mxu1 %vm2709_vm9, %v3252_v5  ;;  %v6181_v63 = vrot.slane %v3911_v55, 6  ;;  %v4212_v3 = vrot.slane %v3911_v55, 2  ;;  %v4017_v4 = vrot.slane %v6177_v58, 4  ;;  %v4990_v55 = vld [vmem:[%s6365_s14 + $0x18] sm:$0xf] }
 0x3cc   : > { %5276 = vmatprep.mubr.msk.f32.mxu0 %vm5572_vm0, %v5571_v0  ;;  %5281 = vmatprep.mubr.msk.f32.mxu1 %vm5572_vm0, %v5571_v0 }
 0x3cd   : > { %5284 = vmatprep.subr.msk.mxu0 %vm1454_vm6, %v3334_v6  ;;  %5289 = vmatprep.subr.msk.mxu1 %vm1454_vm6, %v3428_v7 }
 0x3ce   : > { %5277 = vmatmul.mubr.msk.f32.vlgmr.msra.gmra.mxu0 %vm2709_vm9, %v2708_v2  ;;  %5282 = vmatmul.mubr.msk.f32.vlgmr.msra.gmra.mxu1 %vm2709_vm9, %v2708_v2  ;;  %v4016_v2 = vrot.slane %v6175_v47, 4 }
 0x3cf   : > { %5286 = vmatprep.mubr.msk.f32.mxu0 %vm2080_vm7, %v5924_v53  ;;  %5291 = vmatprep.mubr.msk.f32.mxu1 %vm2080_vm7, %v5994_v40 }
 0x3d0   : > { %5285 = vmatpush3.msk.msra.mxu0 %vm1454_vm6, %v3334_v6  ;;  %5290 = vmatpush3.msk.msra.mxu1 %vm1454_vm6, %v3428_v7  ;;  %v4018_v14 = vsel %vm1454_vm6, %v4016_v2, %v4017_v4 }
 0x3d1   : > { %5294 = vmatprep.subr.msk.mxu0 %vm1454_vm6, %v3516_v9  ;;  %5299 = vmatprep.subr.msk.mxu1 %vm1454_vm6, %v3604_v13 }
 0x3d2   : > { %5287 = vmatmul.mubr.msk.f32.vlgmr.msra.gmra.mxu0 %vm2080_vm7, %v5927_v59  ;;  %5292 = vmatmul.mubr.msk.f32.vlgmr.msra.gmra.mxu1 %vm2080_vm7, %v5997_v46 }
 0x3d3   : > { %5296 = vmatprep.mubr.msk.f32.mxu0 %vm2080_vm7, %v6117_v11  ;;  %5295 = vmatpush3.msk.msra.mxu0 %vm1454_vm6, %v3516_v9  ;;  %v3914_v9 = vsel %vm2713_vm8, %v6179_v60, %v6181_v63 }
 0x3d4   : > { %5300 = vmatpush3.msk.msra.mxu1 %vm1454_vm6, %v3604_v13  ;;  %5304 = vmatprep.subr.msk.mxu0 %vm1454_vm6, %v3719_v30  ;;  %v4213_v13 = vsel %vm3926_vm11, %v4211_v1, %v4212_v3 }
 0x3d5   : > { %5309 = vmatprep.subr.msk.mxu1 %vm1454_vm6, %v4970_v31 }
 0x3d6   : > { %5297 = vmatmul.mubr.msk.f32.vlgmr.msra.gmra.mxu0 %vm2080_vm7, %v6124_v12 }
 0x3d7   : > { %5305 = vmatpush3.msk.msra.mxu0 %vm1454_vm6, %v3719_v30 }
 0x3d8   : > { %5314 = vmatprep.subr.msk.mxu0 %vm1454_vm6, %v6161_v32 }
 0x48a   : > { %v3087_v18 = vpop.f32.mrf.mxu0  ;;  %v3165_v19 = vpop.f32.mrf.mxu1 }
 0x48b   : > { %v3326_v20 = vrot.slane %v3165_v19, 4 }
 0x48c   : > { %v5268_v21 = vpop.f32.mrf.mxu0  ;;  %v5273_v22 = vpop.f32.mrf.mxu1 }
 0x48d   : > { %v6139_v23 = vsel %vm1454_vm6, %v3087_v18, %v3326_v20 }
 0x48e   : > { %v3243_v24 = vpop.f32.mrf.mxu0  ;;  %v3321_v25 = vpop.f32.mrf.mxu1  ;;  %5301 = vmatprep.mubr.msk.f32.mxu1 %vm2080_vm7, %v6139_v23 }
 0x48f   : > { %v3329_v26 = vrot.slane %v3321_v25, 4 }
 0x490   : > { %v5278_v27 = vpop.f32.mrf.mxu0  ;;  %v5283_v28 = vpop.f32.mrf.mxu1 }
 0x491   : > { %v6144_v29 = vsel %vm1454_vm6, %v3243_v24, %v3329_v26 }
 0x492   : > { %5302 = vmatmul.mubr.msk.f32.vlgmr.msra.gmra.mxu1 %vm2080_vm7, %v6144_v29  ;;  %v5288_v34 = vpop.f32.mrf.mxu0  ;;  %v5293_v38 = vpop.f32.mrf.mxu1 }
 0x493   : > { %5310 = vmatpush3.msk.msra.mxu1 %vm1454_vm6, %v4970_v31  ;;  %v3426_v37 = vadd.f32 %v5288_v34, %v4956_v35  ;;  %v4982_v31 = vld [vmem:[%s6365_s14 + $0x10] sm:$0xf] }
 0x494   : > { %5319 = vmatprep.subr.msk.mxu1 %vm1454_vm6, %v6168_v33  ;;  %v3410_v36 = vpop.f32.mrf.mxu0  ;;  %v3504_v43 = vpop.f32.mrf.mxu1 }
 0x495   : > { %v3425_v39 = vadd.f32 %v4956_v35, %v3410_v36  ;;  %v3514_v42 = vadd.f32 %v5293_v38, %v3426_v37 }
 0x496   : > { %v5298_v41 = vpop.f32.mrf.mxu0 }
 0x497   : > { %v3513_v45 = vadd.f32 %v3504_v43, %v3425_v39  ;;  %v3602_v49 = vadd.f32 %v5298_v41, %v3514_v42 }
 0x498   : > { %v3592_v48 = vpop.f32.mrf.mxu0 }
 0x499   : > { %v3601_v51 = vadd.f32 %v3592_v48, %v3513_v45  ;;  %v4986_v48 = vld [vmem:[%s6365_s14 + $0x14] sm:$0xf] }
 0x552   : > { %v5303_v50 = vpop.f32.mrf.mxu1 }
 0x553   : > { %v3690_v52 = vadd.f32 %v5303_v50, %v3602_v49 }
 0x554   : > { %v3680_v54 = vpop.f32.mrf.mxu1 }
 0x555   : > { %v3692_v56 = vmax.f32 %v3690_v52, 0.0  ;;  %v3689_v57 = vadd.f32 %v3680_v54, %v3601_v51 }
 0x557   : > { %v3697_v61 = vrot.slane %v3692_v56, 3  ;;  %v3691_v62 = vmax.f32 %v3689_v57, 0.0 }
 0x559   : > { %v3696_v5 = vrot.slane %v3691_v62, 3  ;;  %v6185_v6 = vsel %vm3695_vm10, %v3697_v61, 0.0 }
 0x55a   : > { %v3920_v17 = vmul.f32 %v6181_v63, %v6185_v6  ;;  %v4024_v19 = vmul.f32 %v4017_v4, %v6185_v6  ;;  %v3820_v25 = vrot.slane %v6185_v6, 1  ;;  %v4219_v34 = vmul.f32 %v4212_v3, %v6185_v6 }
 0x55b   : > { %v6187_v7 = vsel %vm3695_vm10, %v3696_v5, %v3697_v61  ;;  %v3702_v8 = vsel %vm3695_vm10, 0.0, %v3696_v5  ;;  %v4125_v57 = vrot.slane %v6185_v6, 5  ;;  %v4994_v61 = vld [vmem:[%s6365_s14 + $0x1c] sm:$0xf]  ;;  %v4998_v5 = vld [vmem:[%s6365_s14 + $0x20] sm:$0xf] }
 0x55c   : > { %v3919_v10 = vmul.f32 %v3914_v9, %v6187_v7  ;;  %v3718_v18 = vmul.f32 %v6177_v58, %v6187_v7  ;;  %v3717_v20 = vmul.f32 %v6175_v47, %v3702_v8  ;;  %v4218_v21 = vmul.f32 %v4213_v13, %v6187_v7 }
 0x55d   : > { %v3817_v22 = vrot.slane %v3702_v8, 1  ;;  %v3818_v24 = vrot.slane %v6187_v7, 1  ;;  %v3918_v27 = vmul.f32 %v6179_v60, %v3702_v8  ;;  %v4022_v28 = vmul.f32 %v4016_v2, %v3702_v8 }
 0x55e   : > { %v3928_v26 = vrot.slane %v3919_v10, 2  ;;  %5306 = vmatprep.mubr.msk.f32.mxu0 %vm2080_vm7, %v3717_v20  ;;  %v4023_v30 = vmul.f32 %v4018_v14, %v6187_v7  ;;  %v4217_v41 = vmul.f32 %v4211_v1, %v3702_v8  ;;  %v3930_v42 = vrot.slane %v3920_v17, 2  ;;  %v4969_v14 = vld [vmem:[%s6367_s27] ss:$0 sm:$0xff] }
 0x55f   : > { %5307 = vmatmul.mubr.msk.f32.vlgmr.msra.gmra.mxu0 %vm2080_vm7, %v3718_v18  ;;  %v3819_v35 = vsel %vm3816_vm12, %v3817_v22, %v3818_v24  ;;  %v3821_v36 = vsel %vm3816_vm12, %v3818_v24, %v3820_v25  ;;  %v3927_v37 = vrot.slane %v3918_v27, 2  ;;  %v4030_v38 = vrot.slane %v4022_v28, 4 }
 0x560   : > { %5311 = vmatprep.mubr.msk.f32.mxu1 %vm2080_vm7, %v3819_v35  ;;  %5315 = vmatpush3.msk.msra.mxu0 %vm1454_vm6, %v6161_v32  ;;  %v4031_v39 = vrot.slane %v4023_v30, 4  ;;  %v4226_v43 = vrot.slane %v4218_v21, 6  ;;  %v4122_v44 = vrot.slane %v3702_v8, 5  ;;  %v4123_v45 = vrot.slane %v6187_v7, 5 }
 0x561   : > { %5312 = vmatmul.mubr.msk.f32.vlgmr.msra.gmra.mxu1 %vm2080_vm7, %v3821_v36  ;;  %5324 = vmatprep.subr.msk.mxu0 %vm1454_vm6, %v4982_v31  ;;  %v4033_v49 = vrot.slane %v4024_v19, 4  ;;  %v3929_v32 = vsel %vm3926_vm11, %v3927_v37, %v3928_v26  ;;  %v4225_v51 = vrot.slane %v4217_v41, 6  ;;  %v3931_v52 = vsel %vm3926_vm11, %v3928_v26, %v3930_v42 }
 0x562   : > { %v4032_v50 = vsel %vm1454_vm6, %v4030_v38, %v4031_v39  ;;  %5320 = vmatpush3.msk.msra.mxu1 %vm1454_vm6, %v6168_v33  ;;  %5316 = vmatprep.mubr.msk.f32.mxu0 %vm2080_vm7, %v3929_v32  ;;  %v4124_v33 = vsel %vm4121_vm13, %v4122_v44, %v4123_v45  ;;  %v4491_v62 = vmul.f32 %v6179_v60, %v6187_v7  ;;  %v4228_v1 = vrot.slane %v4219_v34, 6 }
 0x563   : > { %5321 = vmatprep.mubr.msk.f32.mxu1 %vm2080_vm7, %v4032_v50  ;;  %5317 = vmatmul.mubr.msk.f32.vlgmr.msra.gmra.mxu0 %vm2080_vm7, %v3931_v52  ;;  %v4034_v54 = vsel %vm1454_vm6, %v4031_v39, %v4033_v49  ;;  %v4227_v56 = vsel %vm2713_vm8, %v4225_v51, %v4226_v43  ;;  %v4492_v2 = vmul.f32 %v3914_v9, %v6185_v6  ;;  %v4407_v8 = vrot.slane %v5571_v0, 1 }
 0x564   : > { %5329 = vmatprep.subr.msk.mxu1 %vm1454_vm6, %v4986_v48  ;;  %5325 = vmatpush3.msk.msra.mxu0 %vm1454_vm6, %v4982_v31  ;;  %v4126_v3 = vsel %vm4121_vm13, %v4123_v45, %v4125_v57  ;;  %v4229_v4 = vsel %vm2713_vm8, %v4226_v43, %v4228_v1  ;;  %v4314_v60 = vmul.f32 %v6175_v47, %v6187_v7  ;;  %v4493_v9 = vmul.f32 0.0, %v6181_v63 }
 0x565   : > { %5322 = vmatmul.mubr.msk.f32.vlgmr.msra.gmra.mxu1 %vm2080_vm7, %v4034_v54  ;;  %5326 = vmatprep.mubr.msk.f32.mxu0 %vm2080_vm7, %v4124_v33  ;;  %v4499_v10 = vrot.slane %v4491_v62, 2  ;;  %v4315_v13 = vmul.f32 %v6177_v58, %v6185_v6  ;;  %v4500_v47 = vrot.slane %v4492_v2, 2  ;;  %v4408_v0 = vsel %vm3816_vm12, %v3820_v25, %v4407_v8 }
 0x566   : > { %5331 = vmatprep.mubr.msk.f32.mxu1 %vm2080_vm7, %v4227_v56  ;;  %5330 = vmatpush3.msk.msra.mxu1 %vm1454_vm6, %v4986_v48  ;;  %v4502_v63 = vrot.slane %v4493_v9, 2 }
 0x567   : > { %5334 = vmatprep.subr.msk.mxu0 %vm1454_vm6, %v4990_v55  ;;  %5327 = vmatmul.mubr.msk.f32.vlgmr.msra.gmra.mxu0 %vm2080_vm7, %v4126_v3  ;;  %v4501_v58 = vsel %vm3926_vm11, %v4499_v10, %v4500_v47  ;;  %v5575_v10 = vmov 2  }
 0x568   : > { %5339 = vmatprep.subr.msk.mxu1 %vm1454_vm6, %v4994_v61  ;;  %5335 = vmatpush3.msk.msra.mxu0 %vm1454_vm6, %v4990_v55  ;;  %v4503_v7 = vsel %vm3926_vm11, %v4500_v47, %v4502_v63 }
 0x569   : > { %5332 = vmatmul.mubr.msk.f32.vlgmr.msra.gmra.mxu1 %vm2080_vm7, %v4229_v4  ;;  %5336 = vmatprep.mubr.msk.f32.mxu0 %vm2080_vm7, %v4314_v60 }
 0x56a   : > { %5341 = vmatprep.mubr.msk.f32.mxu1 %vm2080_vm7, %v3821_v36  ;;  %5340 = vmatpush3.msk.msra.mxu1 %vm1454_vm6, %v4994_v61 }
 0x56b   : > { %5344 = vmatprep.subr.msk.mxu0 %vm1454_vm6, %v4998_v5  ;;  %5337 = vmatmul.mubr.msk.f32.vlgmr.msra.gmra.mxu0 %vm2080_vm7, %v4315_v13  ;;  %v5576_v13 = vmov 3  }
 0x56c   : > { %5345 = vmatpush3.msk.msra.mxu0 %vm1454_vm6, %v4998_v5  ;;  %5346 = vmatprep.mubr.msk.f32.mxu0 %vm2080_vm7, %v4501_v58 }
 0x56d   : > { %5342 = vmatmul.mubr.msk.f32.vlgmr.msra.gmra.mxu1 %vm2080_vm7, %v4408_v0 }
 0x56f   : > { %5347 = vmatmul.mubr.msk.f32.vlgmr.msra.gmra.mxu0 %vm2080_vm7, %v4503_v7 }
 0x61f   : > { %v5308_v6 = vpop.f32.mrf.mxu0 }
 0x620   : > { %v3811_v17 = vadd.f32 %v5308_v6, %v4969_v14 }
 0x621   : > { %v5313_v18 = vpop.f32.mrf.mxu1  ;;  %v3795_v19 = vpop.f32.mrf.mxu0 }
 0x622   : > { %v3905_v20 = vadd.f32 %v5313_v18, %v3811_v17  ;;  %v3810_v21 = vadd.f32 %v4969_v14, %v3795_v19 }
 0x623   : > { %v3895_v22 = vpop.f32.mrf.mxu1  ;;  %v5318_v25 = vpop.f32.mrf.mxu0 }
 0x624   : > { %v3904_v24 = vadd.f32 %v3895_v22, %v3810_v21  ;;  %v4015_v26 = vadd.f32 %v5318_v25, %v3905_v20 }
 0x625   : > { %v5323_v27 = vpop.f32.mrf.mxu1  ;;  %v4005_v28 = vpop.f32.mrf.mxu0 }
 0x626   : > { %v4118_v30 = vadd.f32 %v5323_v27, %v4015_v26  ;;  %v4014_v31 = vadd.f32 %v4005_v28, %v3904_v24 }
 0x627   : > { %v4108_v34 = vpop.f32.mrf.mxu1  ;;  %v5328_v35 = vpop.f32.mrf.mxu0 }
 0x628   : > { %v4117_v36 = vadd.f32 %v4108_v34, %v4014_v31  ;;  %v4210_v37 = vadd.f32 %v5328_v35, %v4118_v30 }
 0x629   : > { %v5333_v38 = vpop.f32.mrf.mxu1  ;;  %v4200_v39 = vpop.f32.mrf.mxu0 }
 0x62a   : > { %v4313_v41 = vadd.f32 %v5333_v38, %v4210_v37  ;;  %v4209_v42 = vadd.f32 %v4200_v39, %v4117_v36 }
 0x62b   : > { %v4303_v43 = vpop.f32.mrf.mxu1  ;;  %v5338_v44 = vpop.f32.mrf.mxu0 }
 0x62c   : > { %v4312_v45 = vadd.f32 %v4303_v43, %v4209_v42  ;;  %v4403_v48 = vadd.f32 %v5338_v44, %v4313_v41 }
 0x62d   : > { %v5343_v49 = vpop.f32.mrf.mxu1  ;;  %v4393_v32 = vpop.f32.mrf.mxu0 }
 0x62e   : > { %v4490_v50 = vadd.f32 %v5343_v49, %v4403_v48  ;;  %v4402_v51 = vadd.f32 %v4393_v32, %v4312_v45 }
 0x62f   : > { %v4480_v52 = vpop.f32.mrf.mxu1  ;;  %v5348_v54 = vpop.f32.mrf.mxu0 }
 0x630   : > { %v4489_v55 = vadd.f32 %v4480_v52, %v4402_v51  ;;  %v4587_v33 = vadd.f32 %v5348_v54, %v4490_v50 }
 0x631   : > { %v4577_v56 = vpop.f32.mrf.mxu0 }
 0x632   : > { %v4589_v57 = vsub.f32 0.0, %v4587_v33  ;;  %v4586_v61 = vadd.f32 %v4577_v56, %v4489_v55 }
 0x634   : > { %v4592_v62 = vmul.f32 1.442695, %v4589_v57  ;;  %v4588_v1 = vsub.f32 0.0, %v4586_v61 }
 0x636   : > { %5421 = vpow2.f32 %v4592_v62  ;;  %v4590_v2 = vmul.f32 1.442695, %v4588_v1 }
 0x638   : > { %5423 = vpow2.f32 %v4590_v2 }
 0x643   : > { %v5422_v3 = vpop.eup %5421 }
 0x644   : > { %v4595_v4 = vadd.f32 1.0, %v5422_v3 }
 0x645   : > { %v5424_v60 = vpop.eup %5423 }
 0x646   : > { %5425 = vrcp.f32 %v4595_v4  ;;  %v4594_v5 = vadd.f32 1.0, %v5424_v60 }
 0x648   : > { %5427 = vrcp.f32 %v4594_v5 }
 0x653   : > { %v5426_v8 = vpop.eup %5425 }
 0x654   : > { %4617 = vperm.xlu0 %5413, %v5426_v8   ;;  %4607 = vperm.xlu1 %5414, %v5426_v8  }
 0x655   : > { %v5428_v9 = vpop.eup %5427 }
 0x658   : > { %5416 = vset.pattern.permute.xlu0 %v5574_v16  ;;  %5415 = vset.pattern.permute.xlu1 %v5575_v10 }
 0x659   : > { %4629 = vperm.xlu1 %5415, %v5426_v8   ;;  %4602 = vperm.xlu0 %5416, %v5428_v9  }
 0x65d   : > { %5417 = vset.pattern.permute.xlu1 %v5573_v15  ;;  %5419 = vset.pattern.permute.xlu0 %v5576_v13 }
 0x65e   : > { %4613 = vperm.xlu1 %5417, %v5428_v9   ;;  %4637 = vperm.xlu0 %5419, %v5428_v9  }
 0x662   : > { %5418 = vset.pattern.permute.xlu1 %v5575_v10 }
 0x663   : > { %4625 = vperm.xlu1 %5418, %v5428_v9  }
 0x667   : > { %5420 = vset.pattern.permute.xlu1 %v5576_v13 }
 0x668   : > { %4641 = vperm.xlu1 %5420, %v5426_v8  }
 0x6cf   : > { %v4608_v47 = vpop.permute.xlu1 %4607  ;;  %v4618_v0 = vpop.permute.xlu0 %4617 }
 0x6d0   : > { %v4621_v15 = vmul.f32 %v4618_v0, %v5997_v46  ;;  %v4611_v6 = vmul.f32 %v4608_v47, %v5927_v59 }
 0x6d2   : > { %v4623_v25 = vadd.f32 %v4621_v15, %v4611_v6 }
 0x6d4   : > { %v4630_v63 = vpop.permute.xlu1 %4629  ;;  %v4603_v58 = vpop.permute.xlu0 %4602 }
 0x6d5   : > { %v4610_v14 = vmul.f32 %v4603_v58, %v5924_v53  ;;  %v4633_v21 = vmul.f32 %v4630_v63, %v6124_v12 }
 0x6d7   : > { %v4635_v46 = vadd.f32 %v4633_v21, %v4623_v25 }
 0x6d9   : > { %v4614_v16 = vpop.permute.xlu1 %4613  ;;  %v4638_v17 = vpop.permute.xlu0 %4637 }
 0x6da   : > { %v4620_v7 = vmul.f32 %v4614_v16, %v5994_v40  ;;  %v4644_v22 = vmul.f32 %v4638_v17, %v6139_v23 }
 0x6dc   : > { %v4622_v19 = vadd.f32 %v4620_v7, %v4610_v14 }
 0x6de   : > { %v4626_v18 = vpop.permute.xlu1 %4625 }
 0x6df   : > { %v4632_v20 = vmul.f32 %v4626_v18, %v6117_v11 }
 0x6e1   : > { %v4634_v24 = vadd.f32 %v4632_v20, %v4622_v19 }
 0x6e3   : > { %v4646_v53 = vadd.f32 %v4644_v22, %v4634_v24  ;;  %v4642_v40 = vpop.permute.xlu1 %4641 }
 0x6e4   : > { %v4645_v59 = vmul.f32 %v4642_v40, %v6144_v29 }
 0x6e5   : > { %4648 = vst.msk [vmem:[%s831_s16] sm:$0xff] %vm2080_vm7, %v4646_v53 }
 0x6e6   : > { %v4647_v26 = vadd.f32 %v4645_v59, %v4635_v46 }
 0x6e8   : > { %4649 = vst.msk [vmem:[%s831_s16 + $0x8] sm:$0xff] %vm2080_vm7, %v4647_v26 }
 0x6e9 PF: > { %s6369_s1 = sld [smem:[#allocation14_spill]]  ;;  %s6372_s30 = smov %s5555_s0 }
 0x6ea   : > { %s6370_s20 = sld [smem:[#allocation13_spill]] }
 0x6eb   : > { %s6371_s19 = sld [smem:[#allocation15_spill]] }
 0x6ef   : > { %p35_p11 = scmp.ge.s32.totalorder %s6369_s1, 10  }
 0x6f0   : > { %s6373_s0 = smov %s6370_s20 }
 0x6f1   :  { %37 = sbr.rel (!%p35_p11) target bundleno = 25 (0x19), region = 186 }
 0x6f6   :  { %4671 = vsyncpa [#allocation5], 1 }
 0x6f7   :  { %4673 = vsyncpa [#allocation5 + $0x1], 1 }
 0x6f8   :  { %4674 = vsyncpa [#allocation7], 1 }
 0x6f9   :  { %4676 = vsyncpa [#allocation7 + $0x1], 1 }

</bundles_post_ra>
